<compile_context>
chip_gen: v5e
topology: v5e:2x2
jax: 0.10.0
libtpu: 0.0.40
codegen_flags: <defaults>
</compile_context>

<pallas_src>
import numpy as np

import jax
import jax.numpy as jnp
from jax.experimental import pallas as pl
from jax.experimental.pallas import tpu as pltpu


# ------------------------------ fused kernel --------------------------------

def _lenet_kernel(x_ref,
                  m1_ref, b1_ref, rp1_ref, cp1_ref,
                  m2_ref, b2_ref, rp2_ref, cp2_ref,
                  a1_ref, bf1_ref, wf2_ref, bf2_ref, wf3_ref, bf3_ref,
                  o_ref):
    f32 = jnp.float32
    dot = lambda a, b: jnp.dot(a, b, preferred_element_type=f32)

    xt = x_ref[0]                                   # (28, 28) = image^T  (W, H)

    # conv1 + bias + ReLU -> (24, 6*24) transposed channel-stacked map.
    c1 = dot(xt[0:24, :], m1_ref[0])
    for dj in range(1, 5):
        c1 = c1 + dot(xt[dj:dj + 24, :], m1_ref[dj])
    c1 = jnp.maximum(c1 + b1_ref[...], 0.0)

    # 2x2 / stride-2 max-pool -> (12, 6*12): one-hot selector matmuls + max.
    r0 = dot(rp1_ref[0], c1)                        # rows 2i+0
    r1 = dot(rp1_ref[1], c1)                        # rows 2i+1
    p1 = jnp.maximum(
        jnp.maximum(dot(r0, cp1_ref[0]), dot(r0, cp1_ref[1])),
        jnp.maximum(dot(r1, cp1_ref[0]), dot(r1, cp1_ref[1])))

    # conv2 + bias + ReLU -> (8, 16*8).
    c2 = dot(p1[0:8, :], m2_ref[0])
    for dj in range(1, 5):
        c2 = c2 + dot(p1[dj:dj + 8, :], m2_ref[dj])
    c2 = jnp.maximum(c2 + b2_ref[...], 0.0)

    # 2x2 / stride-2 max-pool -> (4, 16*4).
    s0 = dot(rp2_ref[0], c2)
    s1 = dot(rp2_ref[1], c2)
    p2 = jnp.maximum(
        jnp.maximum(dot(s0, cp2_ref[0]), dot(s0, cp2_ref[1])),
        jnp.maximum(dot(s1, cp2_ref[0]), dot(s1, cp2_ref[1])))

    # fc1 + ReLU (row form).  p2's 4 rows are the 'w' positions; a1[w] is the
    # matching (64, 120) weight slab, so no flatten/transpose is needed.
    h1 = bf1_ref[...]                               # (1, 120)
    for w in range(4):
        h1 = h1 + dot(p2[w:w + 1, :], a1_ref[w])
    h1 = jnp.maximum(h1, 0.0)

    # fc2 + ReLU -> (1, 84); fc3 (outputs zero-padded 10 -> 128) -> (1, 128).
    h2 = jnp.maximum(dot(h1, wf2_ref[...]) + bf2_ref[...], 0.0)
    o_ref[0] = dot(h2, wf3_ref[...]) + bf3_ref[...]


# -------------------------- init-time weight packing -------------------------

_WEIGHT_ORDER = ("m1", "b1", "rp1", "cp1", "m2", "b2", "rp2", "cp2",
                 "a1", "bf1", "wf2", "bf2", "wf3", "bf3")


def _pool_selectors(rows_out, rows_in, cols_in, cols_out):
    """One-hot matrices implementing 2x2/stride-2 pooling on a (rows_in, cols_in)
    transposed channel-stacked map:  pooled = max_{a,b} R[b] @ x @ C[a]."""
    r = np.zeros((2, rows_out, rows_in), np.float32)
    c = np.zeros((2, cols_in, cols_out), np.float32)
    for a in range(2):
        for i in range(rows_out):
            r[a, i, 2 * i + a] = 1.0
        for j in range(cols_out):
            c[a, 2 * j + a, j] = 1.0
    return r, c


def init_params(key):
    """PyTorch-default-style synthetic weights, re-packed for the fused kernel.
    Returns (packed_for_kernel, raw_pytorch_layout)."""
    def u(k, shape, fan_in):
        bound = 1.0 / float(np.sqrt(fan_in))
        return np.asarray(jax.random.uniform(k, shape, jnp.float32, -bound, bound))

    ks = jax.random.split(key, 10)
    w1 = u(ks[0], (6, 1, 5, 5), 25);    b1 = u(ks[1], (6,), 25)
    w2 = u(ks[2], (16, 6, 5, 5), 150);  b2 = u(ks[3], (16,), 150)
    fw1 = u(ks[4], (120, 256), 256);    fb1 = u(ks[5], (120,), 256)
    fw2 = u(ks[6], (84, 120), 120);     fb2 = u(ks[7], (84,), 120)
    fw3 = u(ks[8], (10, 84), 84);       fb3 = u(ks[9], (10,), 84)

    # conv1 banded: out^T(24,144) = sum_dj x^T[dj:dj+24, :] @ m1[dj], m1[dj]:(28,144)
    m1 = np.zeros((5, 28, 144), np.float32)
    for dj in range(5):
        for co in range(6):
            for oh in range(24):
                m1[dj, oh:oh + 5, co * 24 + oh] = w1[co, 0, :, dj]
    b1r = np.repeat(b1, 24).reshape(1, 144).astype(np.float32)

    # conv2 banded on the stacked (12, 6*12) input: m2[dj]: (72, 128)
    m2 = np.zeros((5, 72, 128), np.float32)
    for dj in range(5):
        for co in range(16):
            for ci in range(6):
                for oh in range(8):
                    m2[dj, ci * 12 + oh: ci * 12 + oh + 5, co * 8 + oh] = w2[co, ci, :, dj]
    b2r = np.repeat(b2, 8).reshape(1, 128).astype(np.float32)

    rp1, cp1 = _pool_selectors(12, 24, 144, 72)     # (2,12,24), (2,144,72)
    rp2, cp2 = _pool_selectors(4, 8, 128, 64)       # (2,4,8),   (2,128,64)

    # fc1 split into 4 slabs: a1[w][c*4+h, o] = fw1[o, c*16 + h*4 + w]
    a1 = np.ascontiguousarray(
        fw1.reshape(120, 16, 4, 4).transpose(3, 1, 2, 0).reshape(4, 64, 120))
    bf1 = fb1.reshape(1, 120)
    wf2 = np.ascontiguousarray(fw2.T)               # (120, 84)
    bf2 = fb2.reshape(1, 84)
    wf3 = np.zeros((84, 128), np.float32); wf3[:, :10] = fw3.T   # pad 10 -> 128 outs
    bf3 = np.zeros((1, 128), np.float32);  bf3[0, :10] = fb3

    packed = dict(m1=m1, b1=b1r, rp1=rp1, cp1=cp1, m2=m2, b2=b2r,
                  rp2=rp2, cp2=cp2, a1=a1, bf1=bf1, wf2=wf2, bf2=bf2,
                  wf3=wf3, bf3=bf3)
    raw = dict(w1=w1, b1=b1, w2=w2, b2=b2, fw1=fw1, fb1=fb1,
               fw2=fw2, fb2=fb2, fw3=fw3, fb3=fb3)
    return ({k: jnp.asarray(v) for k, v in packed.items()},
            {k: jnp.asarray(v) for k, v in raw.items()})


# --------------------------------- forward ----------------------------------

def _full_spec(a):
    zeros = (0,) * a.ndim
    return pl.BlockSpec(a.shape, lambda i: zeros)


def lenet_forward(x_nchw, packed):
    """x_nchw: (N, 1, 28, 28) float32 -> logits (N, 10)."""
    n = x_nchw.shape[0]
    # Per-image transpose to (W, H): tiny wrapper-side layout plumbing so all
    # in-kernel intermediates are lane-dense on the channel*height axis.
    xt = jnp.swapaxes(x_nchw.reshape(n, 28, 28), 1, 2)
    weights = [packed[k] for k in _WEIGHT_ORDER]

    out = pl.pallas_call(
        _lenet_kernel,
        out_shape=jax.ShapeDtypeStruct((n, 1, 128), jnp.float32),
        grid=(n,),
        in_specs=[pl.BlockSpec((1, 28, 28), lambda i: (i, 0, 0))]
                 + [_full_spec(w) for w in weights],
        out_specs=pl.BlockSpec((1, 1, 128), lambda i: (i, 0, 0)),
        compiler_params=pltpu.CompilerParams(
            dimension_semantics=("parallel",)),
    )(xt, *weights)
    return out[:, 0, :10]                           # drop the zero padding


# ------------------------- pure-JAX reference check --------------------------

def lenet_reference(x, raw):
    P = jax.lax.Precision.HIGHEST
    y = jax.lax.conv_general_dilated(
        x, raw["w1"], (1, 1), "VALID",
        dimension_numbers=("NCHW", "OIHW", "NCHW"), precision=P)
    y = jnp.maximum(y + raw["b1"][None, :, None, None], 0.0)
    y = jax.lax.reduce_window(y, -jnp.inf, jax.lax.max,
                              (1, 1, 2, 2), (1, 1, 2, 2), "VALID")
    y = jax.lax.conv_general_dilated(
        y, raw["w2"], (1, 1), "VALID",
        dimension_numbers=("NCHW", "OIHW", "NCHW"), precision=P)
    y = jnp.maximum(y + raw["b2"][None, :, None, None], 0.0)
    y = jax.lax.reduce_window(y, -jnp.inf, jax.lax.max,
                              (1, 1, 2, 2), (1, 1, 2, 2), "VALID")
    y = y.reshape(y.shape[0], -1)                   # PyTorch view(-1, 256) order
    y = jnp.maximum(jnp.dot(y, raw["fw1"].T, precision=P) + raw["fb1"], 0.0)
    y = jnp.maximum(jnp.dot(y, raw["fw2"].T, precision=P) + raw["fb2"], 0.0)
    return jnp.dot(y, raw["fw3"].T, precision=P) + raw["fb3"]


if __name__ == "__main__":
    key = jax.random.PRNGKey(0)
    k_x, k_p = jax.random.split(key)
    # fc1 = Linear(16*4*4, 120) pins the input shape to (N, 1, 28, 28).
    x = jax.random.normal(k_x, (2, 1, 28, 28), dtype=jnp.float32)
    packed, raw = init_params(k_p)

    out = jax.block_until_ready(jax.jit(lenet_forward)(x, packed))
    assert out.shape == (2, 10), out.shape
    assert out.dtype == jnp.float32

    ref = jax.block_until_ready(lenet_reference(x, raw))
    np.testing.assert_allclose(np.asarray(out), np.asarray(ref),
                               rtol=5e-3, atol=5e-3)
    print("KERNEL_OK")
</pallas_src>

<mosaic_0001>
module attributes {stable_mosaic.version = 11 : i64} {
  func.func @_lenet_kernel(%arg0: i32, %arg1: memref<1x28x28xf32, #tpu.memory_space<vmem>>, %arg2: memref<5x28x144xf32, #tpu.memory_space<vmem>>, %arg3: memref<1x144xf32, #tpu.memory_space<vmem>>, %arg4: memref<2x12x24xf32, #tpu.memory_space<vmem>>, %arg5: memref<2x144x72xf32, #tpu.memory_space<vmem>>, %arg6: memref<5x72x128xf32, #tpu.memory_space<vmem>>, %arg7: memref<1x128xf32, #tpu.memory_space<vmem>>, %arg8: memref<2x4x8xf32, #tpu.memory_space<vmem>>, %arg9: memref<2x128x64xf32, #tpu.memory_space<vmem>>, %arg10: memref<4x64x120xf32, #tpu.memory_space<vmem>>, %arg11: memref<1x120xf32, #tpu.memory_space<vmem>>, %arg12: memref<120x84xf32, #tpu.memory_space<vmem>>, %arg13: memref<1x84xf32, #tpu.memory_space<vmem>>, %arg14: memref<84x128xf32, #tpu.memory_space<vmem>>, %arg15: memref<1x128xf32, #tpu.memory_space<vmem>>, %arg16: memref<1x1x128xf32, #tpu.memory_space<vmem>>) attributes {dimension_semantics = [#tpu.dimension_semantics<parallel>], iteration_bounds = array<i64: 2>, scalar_prefetch = 0 : i64, scratch_operands = 0 : i64, tpu.core_type = #tpu.core_type<tc>, window_params = [{transform_indices = @transform_0, window_bounds = array<i64: 1, 28, 28>}, {pipeline_mode = #tpu.pipeline_mode<synchronous>, transform_indices = @transform_1, window_bounds = array<i64: 5, 28, 144>}, {pipeline_mode = #tpu.pipeline_mode<synchronous>, transform_indices = @transform_2, window_bounds = array<i64: 1, 144>}, {pipeline_mode = #tpu.pipeline_mode<synchronous>, transform_indices = @transform_3, window_bounds = array<i64: 2, 12, 24>}, {pipeline_mode = #tpu.pipeline_mode<synchronous>, transform_indices = @transform_4, window_bounds = array<i64: 2, 144, 72>}, {pipeline_mode = #tpu.pipeline_mode<synchronous>, transform_indices = @transform_5, window_bounds = array<i64: 5, 72, 128>}, {pipeline_mode = #tpu.pipeline_mode<synchronous>, transform_indices = @transform_6, window_bounds = array<i64: 1, 128>}, {pipeline_mode = #tpu.pipeline_mode<synchronous>, transform_indices = @transform_7, window_bounds = array<i64: 2, 4, 8>}, {pipeline_mode = #tpu.pipeline_mode<synchronous>, transform_indices = @transform_8, window_bounds = array<i64: 2, 128, 64>}, {pipeline_mode = #tpu.pipeline_mode<synchronous>, transform_indices = @transform_9, window_bounds = array<i64: 4, 64, 120>}, {pipeline_mode = #tpu.pipeline_mode<synchronous>, transform_indices = @transform_10, window_bounds = array<i64: 1, 120>}, {pipeline_mode = #tpu.pipeline_mode<synchronous>, transform_indices = @transform_11, window_bounds = array<i64: 120, 84>}, {pipeline_mode = #tpu.pipeline_mode<synchronous>, transform_indices = @transform_12, window_bounds = array<i64: 1, 84>}, {pipeline_mode = #tpu.pipeline_mode<synchronous>, transform_indices = @transform_13, window_bounds = array<i64: 84, 128>}, {pipeline_mode = #tpu.pipeline_mode<synchronous>, transform_indices = @transform_14, window_bounds = array<i64: 1, 128>}, {transform_indices = @transform_15, window_bounds = array<i64: 1, 1, 128>}]} {
    %c0 = arith.constant 0 : index
    %c0_0 = arith.constant 0 : index
    %c0_1 = arith.constant 0 : index
    %0 = vector.load %arg1[%c0, %c0_0, %c0_1] : memref<1x28x28xf32, #tpu.memory_space<vmem>>, vector<1x28x28xf32>
    %1 = vector.shape_cast %0 : vector<1x28x28xf32> to vector<28x28xf32>
    %2 = vector.extract_strided_slice %1 {offsets = [0, 0], sizes = [24, 28], strides = [1, 1]} : vector<28x28xf32> to vector<24x28xf32>
    %c0_2 = arith.constant 0 : index
    %c0_3 = arith.constant 0 : index
    %c0_4 = arith.constant 0 : index
    %3 = vector.load %arg2[%c0_2, %c0_3, %c0_4] : memref<5x28x144xf32, #tpu.memory_space<vmem>>, vector<1x28x144xf32>
    %4 = vector.shape_cast %3 : vector<1x28x144xf32> to vector<28x144xf32>
    %cst = arith.constant dense<0.000000e+00> : vector<24x144xf32>
    %5 = tpu.matmul %2, %4, %cst {dimension_numbers = #tpu.dot_dimension_numbers<[1], [0], [0], [1], [0, 0, 1, 1], [], []>} : vector<24x28xf32>, vector<28x144xf32>, vector<24x144xf32> -> vector<24x144xf32>
    %6 = vector.extract_strided_slice %1 {offsets = [1, 0], sizes = [24, 28], strides = [1, 1]} : vector<28x28xf32> to vector<24x28xf32>
    %c1 = arith.constant 1 : index
    %c0_5 = arith.constant 0 : index
    %c0_6 = arith.constant 0 : index
    %7 = vector.load %arg2[%c1, %c0_5, %c0_6] : memref<5x28x144xf32, #tpu.memory_space<vmem>>, vector<1x28x144xf32>
    %8 = vector.shape_cast %7 : vector<1x28x144xf32> to vector<28x144xf32>
    %cst_7 = arith.constant dense<0.000000e+00> : vector<24x144xf32>
    %9 = tpu.matmul %6, %8, %cst_7 {dimension_numbers = #tpu.dot_dimension_numbers<[1], [0], [0], [1], [0, 0, 1, 1], [], []>} : vector<24x28xf32>, vector<28x144xf32>, vector<24x144xf32> -> vector<24x144xf32>
    %10 = arith.addf %5, %9 : vector<24x144xf32>
    %11 = vector.extract_strided_slice %1 {offsets = [2, 0], sizes = [24, 28], strides = [1, 1]} : vector<28x28xf32> to vector<24x28xf32>
    %c2 = arith.constant 2 : index
    %c0_8 = arith.constant 0 : index
    %c0_9 = arith.constant 0 : index
    %12 = vector.load %arg2[%c2, %c0_8, %c0_9] : memref<5x28x144xf32, #tpu.memory_space<vmem>>, vector<1x28x144xf32>
    %13 = vector.shape_cast %12 : vector<1x28x144xf32> to vector<28x144xf32>
    %cst_10 = arith.constant dense<0.000000e+00> : vector<24x144xf32>
    %14 = tpu.matmul %11, %13, %cst_10 {dimension_numbers = #tpu.dot_dimension_numbers<[1], [0], [0], [1], [0, 0, 1, 1], [], []>} : vector<24x28xf32>, vector<28x144xf32>, vector<24x144xf32> -> vector<24x144xf32>
    %15 = arith.addf %10, %14 : vector<24x144xf32>
    %16 = vector.extract_strided_slice %1 {offsets = [3, 0], sizes = [24, 28], strides = [1, 1]} : vector<28x28xf32> to vector<24x28xf32>
    %c3 = arith.constant 3 : index
    %c0_11 = arith.constant 0 : index
    %c0_12 = arith.constant 0 : index
    %17 = vector.load %arg2[%c3, %c0_11, %c0_12] : memref<5x28x144xf32, #tpu.memory_space<vmem>>, vector<1x28x144xf32>
    %18 = vector.shape_cast %17 : vector<1x28x144xf32> to vector<28x144xf32>
    %cst_13 = arith.constant dense<0.000000e+00> : vector<24x144xf32>
    %19 = tpu.matmul %16, %18, %cst_13 {dimension_numbers = #tpu.dot_dimension_numbers<[1], [0], [0], [1], [0, 0, 1, 1], [], []>} : vector<24x28xf32>, vector<28x144xf32>, vector<24x144xf32> -> vector<24x144xf32>
    %20 = arith.addf %15, %19 : vector<24x144xf32>
    %21 = vector.extract_strided_slice %1 {offsets = [4, 0], sizes = [24, 28], strides = [1, 1]} : vector<28x28xf32> to vector<24x28xf32>
    %c4 = arith.constant 4 : index
    %c0_14 = arith.constant 0 : index
    %c0_15 = arith.constant 0 : index
    %22 = vector.load %arg2[%c4, %c0_14, %c0_15] : memref<5x28x144xf32, #tpu.memory_space<vmem>>, vector<1x28x144xf32>
    %23 = vector.shape_cast %22 : vector<1x28x144xf32> to vector<28x144xf32>
    %cst_16 = arith.constant dense<0.000000e+00> : vector<24x144xf32>
    %24 = tpu.matmul %21, %23, %cst_16 {dimension_numbers = #tpu.dot_dimension_numbers<[1], [0], [0], [1], [0, 0, 1, 1], [], []>} : vector<24x28xf32>, vector<28x144xf32>, vector<24x144xf32> -> vector<24x144xf32>
    %25 = arith.addf %20, %24 : vector<24x144xf32>
    %c0_17 = arith.constant 0 : index
    %c0_18 = arith.constant 0 : index
    %26 = vector.load %arg3[%c0_17, %c0_18] : memref<1x144xf32, #tpu.memory_space<vmem>>, vector<1x144xf32>
    %27 = vector.broadcast %26 : vector<1x144xf32> to vector<24x144xf32>
    %28 = arith.addf %25, %27 : vector<24x144xf32>
    %cst_19 = arith.constant 0.000000e+00 : f32
    %29 = vector.broadcast %cst_19 : f32 to vector<24x144xf32>
    %30 = arith.maximumf %28, %29 : vector<24x144xf32>
    %c0_20 = arith.constant 0 : index
    %c0_21 = arith.constant 0 : index
    %c0_22 = arith.constant 0 : index
    %31 = vector.load %arg4[%c0_20, %c0_21, %c0_22] : memref<2x12x24xf32, #tpu.memory_space<vmem>>, vector<1x12x24xf32>
    %32 = vector.shape_cast %31 : vector<1x12x24xf32> to vector<12x24xf32>
    %cst_23 = arith.constant dense<0.000000e+00> : vector<12x144xf32>
    %33 = tpu.matmul %32, %30, %cst_23 {dimension_numbers = #tpu.dot_dimension_numbers<[1], [0], [0], [1], [0, 0, 1, 1], [], []>} : vector<12x24xf32>, vector<24x144xf32>, vector<12x144xf32> -> vector<12x144xf32>
    %c1_24 = arith.constant 1 : index
    %c0_25 = arith.constant 0 : index
    %c0_26 = arith.constant 0 : index
    %34 = vector.load %arg4[%c1_24, %c0_25, %c0_26] : memref<2x12x24xf32, #tpu.memory_space<vmem>>, vector<1x12x24xf32>
    %35 = vector.shape_cast %34 : vector<1x12x24xf32> to vector<12x24xf32>
    %cst_27 = arith.constant dense<0.000000e+00> : vector<12x144xf32>
    %36 = tpu.matmul %35, %30, %cst_27 {dimension_numbers = #tpu.dot_dimension_numbers<[1], [0], [0], [1], [0, 0, 1, 1], [], []>} : vector<12x24xf32>, vector<24x144xf32>, vector<12x144xf32> -> vector<12x144xf32>
    %c0_28 = arith.constant 0 : index
    %c0_29 = arith.constant 0 : index
    %c0_30 = arith.constant 0 : index
    %37 = vector.load %arg5[%c0_28, %c0_29, %c0_30] : memref<2x144x72xf32, #tpu.memory_space<vmem>>, vector<1x144x72xf32>
    %38 = vector.shape_cast %37 : vector<1x144x72xf32> to vector<144x72xf32>
    %cst_31 = arith.constant dense<0.000000e+00> : vector<12x72xf32>
    %39 = tpu.matmul %33, %38, %cst_31 {dimension_numbers = #tpu.dot_dimension_numbers<[1], [0], [0], [1], [0, 0, 1, 1], [], []>} : vector<12x144xf32>, vector<144x72xf32>, vector<12x72xf32> -> vector<12x72xf32>
    %c1_32 = arith.constant 1 : index
    %c0_33 = arith.constant 0 : index
    %c0_34 = arith.constant 0 : index
    %40 = vector.load %arg5[%c1_32, %c0_33, %c0_34] : memref<2x144x72xf32, #tpu.memory_space<vmem>>, vector<1x144x72xf32>
    %41 = vector.shape_cast %40 : vector<1x144x72xf32> to vector<144x72xf32>
    %cst_35 = arith.constant dense<0.000000e+00> : vector<12x72xf32>
    %42 = tpu.matmul %33, %41, %cst_35 {dimension_numbers = #tpu.dot_dimension_numbers<[1], [0], [0], [1], [0, 0, 1, 1], [], []>} : vector<12x144xf32>, vector<144x72xf32>, vector<12x72xf32> -> vector<12x72xf32>
    %43 = arith.maximumf %39, %42 : vector<12x72xf32>
    %c0_36 = arith.constant 0 : index
    %c0_37 = arith.constant 0 : index
    %c0_38 = arith.constant 0 : index
    %44 = vector.load %arg5[%c0_36, %c0_37, %c0_38] : memref<2x144x72xf32, #tpu.memory_space<vmem>>, vector<1x144x72xf32>
    %45 = vector.shape_cast %44 : vector<1x144x72xf32> to vector<144x72xf32>
    %cst_39 = arith.constant dense<0.000000e+00> : vector<12x72xf32>
    %46 = tpu.matmul %36, %45, %cst_39 {dimension_numbers = #tpu.dot_dimension_numbers<[1], [0], [0], [1], [0, 0, 1, 1], [], []>} : vector<12x144xf32>, vector<144x72xf32>, vector<12x72xf32> -> vector<12x72xf32>
    %c1_40 = arith.constant 1 : index
    %c0_41 = arith.constant 0 : index
    %c0_42 = arith.constant 0 : index
    %47 = vector.load %arg5[%c1_40, %c0_41, %c0_42] : memref<2x144x72xf32, #tpu.memory_space<vmem>>, vector<1x144x72xf32>
    %48 = vector.shape_cast %47 : vector<1x144x72xf32> to vector<144x72xf32>
    %cst_43 = arith.constant dense<0.000000e+00> : vector<12x72xf32>
    %49 = tpu.matmul %36, %48, %cst_43 {dimension_numbers = #tpu.dot_dimension_numbers<[1], [0], [0], [1], [0, 0, 1, 1], [], []>} : vector<12x144xf32>, vector<144x72xf32>, vector<12x72xf32> -> vector<12x72xf32>
    %50 = arith.maximumf %46, %49 : vector<12x72xf32>
    %51 = arith.maximumf %43, %50 : vector<12x72xf32>
    %52 = vector.extract_strided_slice %51 {offsets = [0, 0], sizes = [8, 72], strides = [1, 1]} : vector<12x72xf32> to vector<8x72xf32>
    %c0_44 = arith.constant 0 : index
    %c0_45 = arith.constant 0 : index
    %c0_46 = arith.constant 0 : index
    %53 = vector.load %arg6[%c0_44, %c0_45, %c0_46] : memref<5x72x128xf32, #tpu.memory_space<vmem>>, vector<1x72x128xf32>
    %54 = vector.shape_cast %53 : vector<1x72x128xf32> to vector<72x128xf32>
    %cst_47 = arith.constant dense<0.000000e+00> : vector<8x128xf32>
    %55 = tpu.matmul %52, %54, %cst_47 {dimension_numbers = #tpu.dot_dimension_numbers<[1], [0], [0], [1], [0, 0, 1, 1], [], []>} : vector<8x72xf32>, vector<72x128xf32>, vector<8x128xf32> -> vector<8x128xf32>
    %56 = vector.extract_strided_slice %51 {offsets = [1, 0], sizes = [8, 72], strides = [1, 1]} : vector<12x72xf32> to vector<8x72xf32>
    %c1_48 = arith.constant 1 : index
    %c0_49 = arith.constant 0 : index
    %c0_50 = arith.constant 0 : index
    %57 = vector.load %arg6[%c1_48, %c0_49, %c0_50] : memref<5x72x128xf32, #tpu.memory_space<vmem>>, vector<1x72x128xf32>
    %58 = vector.shape_cast %57 : vector<1x72x128xf32> to vector<72x128xf32>
    %cst_51 = arith.constant dense<0.000000e+00> : vector<8x128xf32>
    %59 = tpu.matmul %56, %58, %cst_51 {dimension_numbers = #tpu.dot_dimension_numbers<[1], [0], [0], [1], [0, 0, 1, 1], [], []>} : vector<8x72xf32>, vector<72x128xf32>, vector<8x128xf32> -> vector<8x128xf32>
    %60 = arith.addf %55, %59 : vector<8x128xf32>
    %61 = vector.extract_strided_slice %51 {offsets = [2, 0], sizes = [8, 72], strides = [1, 1]} : vector<12x72xf32> to vector<8x72xf32>
    %c2_52 = arith.constant 2 : index
    %c0_53 = arith.constant 0 : index
    %c0_54 = arith.constant 0 : index
    %62 = vector.load %arg6[%c2_52, %c0_53, %c0_54] : memref<5x72x128xf32, #tpu.memory_space<vmem>>, vector<1x72x128xf32>
    %63 = vector.shape_cast %62 : vector<1x72x128xf32> to vector<72x128xf32>
    %cst_55 = arith.constant dense<0.000000e+00> : vector<8x128xf32>
    %64 = tpu.matmul %61, %63, %cst_55 {dimension_numbers = #tpu.dot_dimension_numbers<[1], [0], [0], [1], [0, 0, 1, 1], [], []>} : vector<8x72xf32>, vector<72x128xf32>, vector<8x128xf32> -> vector<8x128xf32>
    %65 = arith.addf %60, %64 : vector<8x128xf32>
    %66 = vector.extract_strided_slice %51 {offsets = [3, 0], sizes = [8, 72], strides = [1, 1]} : vector<12x72xf32> to vector<8x72xf32>
    %c3_56 = arith.constant 3 : index
    %c0_57 = arith.constant 0 : index
    %c0_58 = arith.constant 0 : index
    %67 = vector.load %arg6[%c3_56, %c0_57, %c0_58] : memref<5x72x128xf32, #tpu.memory_space<vmem>>, vector<1x72x128xf32>
    %68 = vector.shape_cast %67 : vector<1x72x128xf32> to vector<72x128xf32>
    %cst_59 = arith.constant dense<0.000000e+00> : vector<8x128xf32>
    %69 = tpu.matmul %66, %68, %cst_59 {dimension_numbers = #tpu.dot_dimension_numbers<[1], [0], [0], [1], [0, 0, 1, 1], [], []>} : vector<8x72xf32>, vector<72x128xf32>, vector<8x128xf32> -> vector<8x128xf32>
    %70 = arith.addf %65, %69 : vector<8x128xf32>
    %71 = vector.extract_strided_slice %51 {offsets = [4, 0], sizes = [8, 72], strides = [1, 1]} : vector<12x72xf32> to vector<8x72xf32>
    %c4_60 = arith.constant 4 : index
    %c0_61 = arith.constant 0 : index
    %c0_62 = arith.constant 0 : index
    %72 = vector.load %arg6[%c4_60, %c0_61, %c0_62] : memref<5x72x128xf32, #tpu.memory_space<vmem>>, vector<1x72x128xf32>
    %73 = vector.shape_cast %72 : vector<1x72x128xf32> to vector<72x128xf32>
    %cst_63 = arith.constant dense<0.000000e+00> : vector<8x128xf32>
    %74 = tpu.matmul %71, %73, %cst_63 {dimension_numbers = #tpu.dot_dimension_numbers<[1], [0], [0], [1], [0, 0, 1, 1], [], []>} : vector<8x72xf32>, vector<72x128xf32>, vector<8x128xf32> -> vector<8x128xf32>
    %75 = arith.addf %70, %74 : vector<8x128xf32>
    %c0_64 = arith.constant 0 : index
    %c0_65 = arith.constant 0 : index
    %76 = vector.load %arg7[%c0_64, %c0_65] : memref<1x128xf32, #tpu.memory_space<vmem>>, vector<1x128xf32>
    %77 = vector.broadcast %76 : vector<1x128xf32> to vector<8x128xf32>
    %78 = arith.addf %75, %77 : vector<8x128xf32>
    %cst_66 = arith.constant 0.000000e+00 : f32
    %79 = vector.broadcast %cst_66 : f32 to vector<8x128xf32>
    %80 = arith.maximumf %78, %79 : vector<8x128xf32>
    %c0_67 = arith.constant 0 : index
    %c0_68 = arith.constant 0 : index
    %c0_69 = arith.constant 0 : index
    %81 = vector.load %arg8[%c0_67, %c0_68, %c0_69] : memref<2x4x8xf32, #tpu.memory_space<vmem>>, vector<1x4x8xf32>
    %82 = vector.shape_cast %81 : vector<1x4x8xf32> to vector<4x8xf32>
    %cst_70 = arith.constant dense<0.000000e+00> : vector<4x128xf32>
    %83 = tpu.matmul %82, %80, %cst_70 {dimension_numbers = #tpu.dot_dimension_numbers<[1], [0], [0], [1], [0, 0, 1, 1], [], []>} : vector<4x8xf32>, vector<8x128xf32>, vector<4x128xf32> -> vector<4x128xf32>
    %c1_71 = arith.constant 1 : index
    %c0_72 = arith.constant 0 : index
    %c0_73 = arith.constant 0 : index
    %84 = vector.load %arg8[%c1_71, %c0_72, %c0_73] : memref<2x4x8xf32, #tpu.memory_space<vmem>>, vector<1x4x8xf32>
    %85 = vector.shape_cast %84 : vector<1x4x8xf32> to vector<4x8xf32>
    %cst_74 = arith.constant dense<0.000000e+00> : vector<4x128xf32>
    %86 = tpu.matmul %85, %80, %cst_74 {dimension_numbers = #tpu.dot_dimension_numbers<[1], [0], [0], [1], [0, 0, 1, 1], [], []>} : vector<4x8xf32>, vector<8x128xf32>, vector<4x128xf32> -> vector<4x128xf32>
    %c0_75 = arith.constant 0 : index
    %c0_76 = arith.constant 0 : index
    %c0_77 = arith.constant 0 : index
    %87 = vector.load %arg9[%c0_75, %c0_76, %c0_77] : memref<2x128x64xf32, #tpu.memory_space<vmem>>, vector<1x128x64xf32>
    %88 = vector.shape_cast %87 : vector<1x128x64xf32> to vector<128x64xf32>
    %cst_78 = arith.constant dense<0.000000e+00> : vector<4x64xf32>
    %89 = tpu.matmul %83, %88, %cst_78 {dimension_numbers = #tpu.dot_dimension_numbers<[1], [0], [0], [1], [0, 0, 1, 1], [], []>} : vector<4x128xf32>, vector<128x64xf32>, vector<4x64xf32> -> vector<4x64xf32>
    %c1_79 = arith.constant 1 : index
    %c0_80 = arith.constant 0 : index
    %c0_81 = arith.constant 0 : index
    %90 = vector.load %arg9[%c1_79, %c0_80, %c0_81] : memref<2x128x64xf32, #tpu.memory_space<vmem>>, vector<1x128x64xf32>
    %91 = vector.shape_cast %90 : vector<1x128x64xf32> to vector<128x64xf32>
    %cst_82 = arith.constant dense<0.000000e+00> : vector<4x64xf32>
    %92 = tpu.matmul %83, %91, %cst_82 {dimension_numbers = #tpu.dot_dimension_numbers<[1], [0], [0], [1], [0, 0, 1, 1], [], []>} : vector<4x128xf32>, vector<128x64xf32>, vector<4x64xf32> -> vector<4x64xf32>
    %93 = arith.maximumf %89, %92 : vector<4x64xf32>
    %c0_83 = arith.constant 0 : index
    %c0_84 = arith.constant 0 : index
    %c0_85 = arith.constant 0 : index
    %94 = vector.load %arg9[%c0_83, %c0_84, %c0_85] : memref<2x128x64xf32, #tpu.memory_space<vmem>>, vector<1x128x64xf32>
    %95 = vector.shape_cast %94 : vector<1x128x64xf32> to vector<128x64xf32>
    %cst_86 = arith.constant dense<0.000000e+00> : vector<4x64xf32>
    %96 = tpu.matmul %86, %95, %cst_86 {dimension_numbers = #tpu.dot_dimension_numbers<[1], [0], [0], [1], [0, 0, 1, 1], [], []>} : vector<4x128xf32>, vector<128x64xf32>, vector<4x64xf32> -> vector<4x64xf32>
    %c1_87 = arith.constant 1 : index
    %c0_88 = arith.constant 0 : index
    %c0_89 = arith.constant 0 : index
    %97 = vector.load %arg9[%c1_87, %c0_88, %c0_89] : memref<2x128x64xf32, #tpu.memory_space<vmem>>, vector<1x128x64xf32>
    %98 = vector.shape_cast %97 : vector<1x128x64xf32> to vector<128x64xf32>
    %cst_90 = arith.constant dense<0.000000e+00> : vector<4x64xf32>
    %99 = tpu.matmul %86, %98, %cst_90 {dimension_numbers = #tpu.dot_dimension_numbers<[1], [0], [0], [1], [0, 0, 1, 1], [], []>} : vector<4x128xf32>, vector<128x64xf32>, vector<4x64xf32> -> vector<4x64xf32>
    %100 = arith.maximumf %96, %99 : vector<4x64xf32>
    %101 = arith.maximumf %93, %100 : vector<4x64xf32>
    %c0_91 = arith.constant 0 : index
    %c0_92 = arith.constant 0 : index
    %102 = vector.load %arg11[%c0_91, %c0_92] : memref<1x120xf32, #tpu.memory_space<vmem>>, vector<1x120xf32>
    %103 = vector.extract_strided_slice %101 {offsets = [0, 0], sizes = [1, 64], strides = [1, 1]} : vector<4x64xf32> to vector<1x64xf32>
    %c0_93 = arith.constant 0 : index
    %c0_94 = arith.constant 0 : index
    %c0_95 = arith.constant 0 : index
    %104 = vector.load %arg10[%c0_93, %c0_94, %c0_95] : memref<4x64x120xf32, #tpu.memory_space<vmem>>, vector<1x64x120xf32>
    %105 = vector.shape_cast %104 : vector<1x64x120xf32> to vector<64x120xf32>
    %cst_96 = arith.constant dense<0.000000e+00> : vector<1x120xf32>
    %106 = tpu.matmul %103, %105, %cst_96 {dimension_numbers = #tpu.dot_dimension_numbers<[1], [0], [0], [1], [0, 0, 1, 1], [], []>} : vector<1x64xf32>, vector<64x120xf32>, vector<1x120xf32> -> vector<1x120xf32>
    %107 = arith.addf %102, %106 : vector<1x120xf32>
    %108 = vector.extract_strided_slice %101 {offsets = [1, 0], sizes = [1, 64], strides = [1, 1]} : vector<4x64xf32> to vector<1x64xf32>
    %c1_97 = arith.constant 1 : index
    %c0_98 = arith.constant 0 : index
    %c0_99 = arith.constant 0 : index
    %109 = vector.load %arg10[%c1_97, %c0_98, %c0_99] : memref<4x64x120xf32, #tpu.memory_space<vmem>>, vector<1x64x120xf32>
    %110 = vector.shape_cast %109 : vector<1x64x120xf32> to vector<64x120xf32>
    %cst_100 = arith.constant dense<0.000000e+00> : vector<1x120xf32>
    %111 = tpu.matmul %108, %110, %cst_100 {dimension_numbers = #tpu.dot_dimension_numbers<[1], [0], [0], [1], [0, 0, 1, 1], [], []>} : vector<1x64xf32>, vector<64x120xf32>, vector<1x120xf32> -> vector<1x120xf32>
    %112 = arith.addf %107, %111 : vector<1x120xf32>
    %113 = vector.extract_strided_slice %101 {offsets = [2, 0], sizes = [1, 64], strides = [1, 1]} : vector<4x64xf32> to vector<1x64xf32>
    %c2_101 = arith.constant 2 : index
    %c0_102 = arith.constant 0 : index
    %c0_103 = arith.constant 0 : index
    %114 = vector.load %arg10[%c2_101, %c0_102, %c0_103] : memref<4x64x120xf32, #tpu.memory_space<vmem>>, vector<1x64x120xf32>
    %115 = vector.shape_cast %114 : vector<1x64x120xf32> to vector<64x120xf32>
    %cst_104 = arith.constant dense<0.000000e+00> : vector<1x120xf32>
    %116 = tpu.matmul %113, %115, %cst_104 {dimension_numbers = #tpu.dot_dimension_numbers<[1], [0], [0], [1], [0, 0, 1, 1], [], []>} : vector<1x64xf32>, vector<64x120xf32>, vector<1x120xf32> -> vector<1x120xf32>
    %117 = arith.addf %112, %116 : vector<1x120xf32>
    %118 = vector.extract_strided_slice %101 {offsets = [3, 0], sizes = [1, 64], strides = [1, 1]} : vector<4x64xf32> to vector<1x64xf32>
    %c3_105 = arith.constant 3 : index
    %c0_106 = arith.constant 0 : index
    %c0_107 = arith.constant 0 : index
    %119 = vector.load %arg10[%c3_105, %c0_106, %c0_107] : memref<4x64x120xf32, #tpu.memory_space<vmem>>, vector<1x64x120xf32>
    %120 = vector.shape_cast %119 : vector<1x64x120xf32> to vector<64x120xf32>
    %cst_108 = arith.constant dense<0.000000e+00> : vector<1x120xf32>
    %121 = tpu.matmul %118, %120, %cst_108 {dimension_numbers = #tpu.dot_dimension_numbers<[1], [0], [0], [1], [0, 0, 1, 1], [], []>} : vector<1x64xf32>, vector<64x120xf32>, vector<1x120xf32> -> vector<1x120xf32>
    %122 = arith.addf %117, %121 : vector<1x120xf32>
    %cst_109 = arith.constant 0.000000e+00 : f32
    %123 = vector.broadcast %cst_109 : f32 to vector<1x120xf32>
    %124 = arith.maximumf %122, %123 : vector<1x120xf32>
    %c0_110 = arith.constant 0 : index
    %c0_111 = arith.constant 0 : index
    %125 = vector.load %arg12[%c0_110, %c0_111] : memref<120x84xf32, #tpu.memory_space<vmem>>, vector<120x84xf32>
    %cst_112 = arith.constant dense<0.000000e+00> : vector<1x84xf32>
    %126 = tpu.matmul %124, %125, %cst_112 {dimension_numbers = #tpu.dot_dimension_numbers<[1], [0], [0], [1], [0, 0, 1, 1], [], []>} : vector<1x120xf32>, vector<120x84xf32>, vector<1x84xf32> -> vector<1x84xf32>
    %c0_113 = arith.constant 0 : index
    %c0_114 = arith.constant 0 : index
    %127 = vector.load %arg13[%c0_113, %c0_114] : memref<1x84xf32, #tpu.memory_space<vmem>>, vector<1x84xf32>
    %128 = arith.addf %126, %127 : vector<1x84xf32>
    %cst_115 = arith.constant 0.000000e+00 : f32
    %129 = vector.broadcast %cst_115 : f32 to vector<1x84xf32>
    %130 = arith.maximumf %128, %129 : vector<1x84xf32>
    %c0_116 = arith.constant 0 : index
    %c0_117 = arith.constant 0 : index
    %131 = vector.load %arg14[%c0_116, %c0_117] : memref<84x128xf32, #tpu.memory_space<vmem>>, vector<84x128xf32>
    %cst_118 = arith.constant dense<0.000000e+00> : vector<1x128xf32>
    %132 = tpu.matmul %130, %131, %cst_118 {dimension_numbers = #tpu.dot_dimension_numbers<[1], [0], [0], [1], [0, 0, 1, 1], [], []>} : vector<1x84xf32>, vector<84x128xf32>, vector<1x128xf32> -> vector<1x128xf32>
    %c0_119 = arith.constant 0 : index
    %c0_120 = arith.constant 0 : index
    %133 = vector.load %arg15[%c0_119, %c0_120] : memref<1x128xf32, #tpu.memory_space<vmem>>, vector<1x128xf32>
    %134 = arith.addf %132, %133 : vector<1x128xf32>
    %c0_121 = arith.constant 0 : index
    %c0_122 = arith.constant 0 : index
    %c0_123 = arith.constant 0 : index
    %135 = vector.load %arg16[%c0_121, %c0_122, %c0_123] : memref<1x1x128xf32, #tpu.memory_space<vmem>>, vector<1x1x128xf32>
    %136 = vector.shape_cast %135 : vector<1x1x128xf32> to vector<1x128xf32>
    %137 = vector.shape_cast %134 : vector<1x128xf32> to vector<1x1x128xf32>
    tpu.vector_store %arg16[%c0_121, %c0_122, %c0_123], %137 {strides = array<i32>} : memref<1x1x128xf32, #tpu.memory_space<vmem>>, vector<1x1x128xf32>,
    return
  }
  func.func @transform_0(%arg0: i32) -> (i32, i32, i32) {
    %c0_i32 = arith.constant 0 : i32
    %c0_i32_0 = arith.constant 0 : i32
    %c0_i32_1 = arith.constant 0 : i32
    return %arg0, %c0_i32, %c0_i32_0 : i32, i32, i32
  }
  func.func @transform_1(%arg0: i32) -> (i32, i32, i32) {
    %c0_i32 = arith.constant 0 : i32
    %c0_i32_0 = arith.constant 0 : i32
    %c0_i32_1 = arith.constant 0 : i32
    %c0_i32_2 = arith.constant 0 : i32
    return %c0_i32, %c0_i32_0, %c0_i32_1 : i32, i32, i32
  }
  func.func @transform_2(%arg0: i32) -> (i32, i32) {
    %c0_i32 = arith.constant 0 : i32
    %c0_i32_0 = arith.constant 0 : i32
    %c0_i32_1 = arith.constant 0 : i32
    return %c0_i32, %c0_i32_0 : i32, i32
  }
  func.func @transform_3(%arg0: i32) -> (i32, i32, i32) {
    %c0_i32 = arith.constant 0 : i32
    %c0_i32_0 = arith.constant 0 : i32
    %c0_i32_1 = arith.constant 0 : i32
    %c0_i32_2 = arith.constant 0 : i32
    return %c0_i32, %c0_i32_0, %c0_i32_1 : i32, i32, i32
  }
  func.func @transform_4(%arg0: i32) -> (i32, i32, i32) {
    %c0_i32 = arith.constant 0 : i32
    %c0_i32_0 = arith.constant 0 : i32
    %c0_i32_1 = arith.constant 0 : i32
    %c0_i32_2 = arith.constant 0 : i32
    return %c0_i32, %c0_i32_0, %c0_i32_1 : i32, i32, i32
  }
  func.func @transform_5(%arg0: i32) -> (i32, i32, i32) {
    %c0_i32 = arith.constant 0 : i32
    %c0_i32_0 = arith.constant 0 : i32
    %c0_i32_1 = arith.constant 0 : i32
    %c0_i32_2 = arith.constant 0 : i32
    return %c0_i32, %c0_i32_0, %c0_i32_1 : i32, i32, i32
  }
  func.func @transform_6(%arg0: i32) -> (i32, i32) {
    %c0_i32 = arith.constant 0 : i32
    %c0_i32_0 = arith.constant 0 : i32
    %c0_i32_1 = arith.constant 0 : i32
    return %c0_i32, %c0_i32_0 : i32, i32
  }
  func.func @transform_7(%arg0: i32) -> (i32, i32, i32) {
    %c0_i32 = arith.constant 0 : i32
    %c0_i32_0 = arith.constant 0 : i32
    %c0_i32_1 = arith.constant 0 : i32
    %c0_i32_2 = arith.constant 0 : i32
    return %c0_i32, %c0_i32_0, %c0_i32_1 : i32, i32, i32
  }
  func.func @transform_8(%arg0: i32) -> (i32, i32, i32) {
    %c0_i32 = arith.constant 0 : i32
    %c0_i32_0 = arith.constant 0 : i32
    %c0_i32_1 = arith.constant 0 : i32
    %c0_i32_2 = arith.constant 0 : i32
    return %c0_i32, %c0_i32_0, %c0_i32_1 : i32, i32, i32
  }
  func.func @transform_9(%arg0: i32) -> (i32, i32, i32) {
    %c0_i32 = arith.constant 0 : i32
    %c0_i32_0 = arith.constant 0 : i32
    %c0_i32_1 = arith.constant 0 : i32
    %c0_i32_2 = arith.constant 0 : i32
    return %c0_i32, %c0_i32_0, %c0_i32_1 : i32, i32, i32
  }
  func.func @transform_10(%arg0: i32) -> (i32, i32) {
    %c0_i32 = arith.constant 0 : i32
    %c0_i32_0 = arith.constant 0 : i32
    %c0_i32_1 = arith.constant 0 : i32
    return %c0_i32, %c0_i32_0 : i32, i32
  }
  func.func @transform_11(%arg0: i32) -> (i32, i32) {
    %c0_i32 = arith.constant 0 : i32
    %c0_i32_0 = arith.constant 0 : i32
    %c0_i32_1 = arith.constant 0 : i32
    return %c0_i32, %c0_i32_0 : i32, i32
  }
  func.func @transform_12(%arg0: i32) -> (i32, i32) {
    %c0_i32 = arith.constant 0 : i32
    %c0_i32_0 = arith.constant 0 : i32
    %c0_i32_1 = arith.constant 0 : i32
    return %c0_i32, %c0_i32_0 : i32, i32
  }
  func.func @transform_13(%arg0: i32) -> (i32, i32) {
    %c0_i32 = arith.constant 0 : i32
    %c0_i32_0 = arith.constant 0 : i32
    %c0_i32_1 = arith.constant 0 : i32
    return %c0_i32, %c0_i32_0 : i32, i32
  }
  func.func @transform_14(%arg0: i32) -> (i32, i32) {
    %c0_i32 = arith.constant 0 : i32
    %c0_i32_0 = arith.constant 0 : i32
    %c0_i32_1 = arith.constant 0 : i32
    return %c0_i32, %c0_i32_0 : i32, i32
  }
  func.func @transform_15(%arg0: i32) -> (i32, i32, i32) {
    %c0_i32 = arith.constant 0 : i32
    %c0_i32_0 = arith.constant 0 : i32
    %c0_i32_1 = arith.constant 0 : i32
    return %arg0, %c0_i32, %c0_i32_0 : i32, i32, i32
  }
}

</mosaic_0001>

<bundles_post_ra>
// kernel: lenet_forward.1
= control target key start
LH: loop header
LB: loop body
LE: loop exit
PB: predicated region body
PF: predicated region fallthrough
CT: control target
= control target key end

     0   :  { %s3138_s0 = inlined_call_operand.vmem [shape: f32[2,28,28], index: 0, kind: input, shape index: {}]   ;;  %s3139_s1 = inlined_call_operand.hbm [shape: f32[5,28,144], index: 1, kind: input, shape index: {}]   ;;  %s3140_s2 = inlined_call_operand.vmem [shape: f32[1,144], index: 2, kind: input, shape index: {}]   ;;  %s3141_s3 = inlined_call_operand.vmem [shape: f32[2,12,24], index: 3, kind: input, shape index: {}]   ;;  %s3142_s4 = inlined_call_operand.hbm [shape: f32[2,144,72], index: 4, kind: input, shape index: {}]   ;;  %s3143_s5 = inlined_call_operand.vmem [shape: f32[5,72,128], index: 5, kind: input, shape index: {}]   ;;  %s3144_s6 = inlined_call_operand.vmem [shape: f32[1,128], index: 6, kind: input, shape index: {}]   ;;  %s3145_s7 = inlined_call_operand.vmem [shape: f32[2,4,8], index: 7, kind: input, shape index: {}]   ;;  %s3146_s8 = inlined_call_operand.vmem [shape: f32[2,128,64], index: 8, kind: input, shape index: {}]   ;;  %s3147_s9 = inlined_call_operand.hbm [shape: f32[4,64,120], index: 9, kind: input, shape index: {}]   ;;  %s3148_s10 = inlined_call_operand.vmem [shape: f32[1,120], index: 10, kind: input, shape index: {}]   ;;  %s3149_s11 = inlined_call_operand.vmem [shape: f32[120,84], index: 11, kind: input, shape index: {}]   ;;  %s3150_s12 = inlined_call_operand.vmem [shape: f32[1,84], index: 12, kind: input, shape index: {}]   ;;  %s3151_s13 = inlined_call_operand.vmem [shape: f32[84,128], index: 13, kind: input, shape index: {}]   ;;  %s3152_s14 = inlined_call_operand.vmem [shape: f32[1,128], index: 14, kind: input, shape index: {}]   ;;  %s3153_s15 = inlined_call_operand.hbm [shape: f32[2,1,128], index: 15, kind: output, shape index: {}]  }
   0x1   :  { %3162 = sst [smem:[#allocation19_spill]] %s3139_s1 }
   0x2   :  { %3163 = sst [smem:[#allocation20_spill]] %s3142_s4 }
   0x3   :  { %3164 = sst [smem:[#allocation21_spill]] %s3152_s14 }
   0x4   :  { %20 = vsyncpa [#allocation3], 0 }
   0x5   :  { %21 = vsyncpa [#allocation6], 0 }
   0x6   :  { %22 = vsyncpa [#allocation4], 0 }
   0x7   :  { %24 = vsyncpa [#allocation4 + $0x1], 0  ;;  %s2464_s18 = smov 0   ;;  %s2466_s19 = smov 0  }
   0x8   :  { %s2468_s20 = smov 0   ;;  %s2470_s21 = smov 0  }
   0x9 LB: > { %3165 = sst [smem:[#allocation12_spill]] %s2363_s18  ;;  %s2485_s22 = sadd.s32 4294967295, %s2375_s21   ;;  %s2375_s21 = sphi %s2470_s21, %s3183_s21   ;;  %s2371_s20 = sphi %s2468_s20, %s3185_s20   ;;  %s2367_s19 = sphi %s2466_s19, %s3187_s19   ;;  %s2363_s18 = sphi %s2464_s18, %s3186_s18  }
   0xa   : > { %3166 = sst [smem:[#allocation13_spill]] %s2371_s20  ;;  %s1996_s23 = sadd.s32 4294967294, %s2375_s21  }
   0xb   : > { %3167 = sst [smem:[#allocation14_spill]] %s2375_s21  ;;  %s2489_s24 = sadd.s32 1, %s2375_s21  }
   0xc   : > { %3168 = sst [smem:[#allocation15_spill]] %s2489_s24  ;;  %s357_s25 = sadd.s32 1, %s2371_s20 }
   0xd   : > { %s354_s26 = ssub.s32 %s2375_s21, %s2489_s24  ;;  %p367_p0 = scmp.ne.s32.totalorder %s2371_s20, %s2367_s19 }
   0xe   : > { %p355_p1 = scmp.eq.s32.totalorder %s354_s26, 0  ;;  %p368_p2 = scmp.eq.s32.totalorder %s2485_s22, 1 }
   0xf   : > { %p373_p3 = scmp.ne.s32.totalorder %s2367_s19, %s2363_s18  ;;  %p374_p4 = scmp.eq.s32.totalorder %s1996_s23, 1 }
  0x10   : > { %s2500_s27 = scalar_select %p355_p1, %s2371_s20, %s357_s25  }
  0x11   : > { %p2502_p5 = por %p368_p2, %p367_p0  ;;  %p2506_p6 = por %p374_p4, %p373_p3 }
  0x12   : > { %3169 = sst [smem:[#allocation16_spill]] %s2500_s27  ;;  %p1997_p7 = scmp.ge.s32.totalorder %s2375_s21, 1 }
  0x13   : > { %s3170_s28 = scalar_select %p2502_p5, 1, 0 }
  0x14   : > { %s3172_s29 = scalar_select %p2506_p6, 1, 0 }
  0x15   : > { %3171 = sst [smem:[#allocation17_spill]] %s3170_s28  ;;  %p381_p8 = scmp.lt.s32.totalorder %s2375_s21, 3 }
  0x16   : > { %3173 = sst [smem:[#allocation18_spill]] %s3172_s29  ;;  %p2168_p9 = scmp.eq.s32.totalorder %s2485_s22, 0 }
  0x17   : > { %p2513_p10 = pnand %p1997_p7, %p381_p8  ;;  %s3175_s4 = sld [smem:[#allocation20_spill]] }
  0x18   : > { %s2377_s25 = smov [#allocation5]   ;;  %s3177_s1 = sld [smem:[#allocation19_spill]] }
  0x19   : > { %p2154_p11 = pneg %p2513_p10  ;;  %s414_s26 = sshll.u32 %s2377_s25, 4  ;;  %s415_s26 = int_to_ptr.vmem [resolvable:$true] %s414_s26 }
  0x1a   : > { %s2378_s16 = smov 128   ;;  %s2379_s17 = smov 8  }
  0x1b   : > { %p2524_p12 = pnand %p2168_p9, %p2154_p11  ;;  %s2381_s18 = smov 256  }
  0x1c   : > { %s2382_s21 = smov 16   ;;  %s438_s20 = sshll.u32 %s3147_s9, 4  ;;  %s439_s20 = int_to_ptr.hbm [resolvable:$true] %s438_s20 }
  0x1d   : > { %s412_s23 = sshll.u32 %s3175_s4, 4  ;;  %s2380_s4 = smov [#allocation2]   ;;  %s413_s23 = int_to_ptr.hbm [resolvable:$true] %s412_s23 }
  0x1e   : > { %s392_s29 = sshll.u32 %s3177_s1, 4  ;;  %s394_s25 = sshll.u32 %s2380_s4, 4  ;;  %s393_s29 = int_to_ptr.hbm [resolvable:$true] %s392_s29  ;;  %s395_s25 = int_to_ptr.vmem [resolvable:$true] %s394_s25 }
  0x1f   : > { %2160 = dma.hbm_to_vmem [thread:$0]  (!%p2524_p12), %s413_s23, 4608, %s415_s26, [#allocation6], %s2378_s16, %s2378_s16, %s2379_s17  }
  0x20   : > { %2157 = dma.hbm_to_vmem [thread:$0]  (!%p2524_p12), %s393_s29, 5120, %s395_s25, [#allocation3], %s2381_s18, %s2381_s18, %s2382_s21  }
  0x21   : > { %s2383_s24 = smov [#allocation7]   ;;  %479 = sbr.rel (%p2513_p10) target bundleno = 1378 (0x562), region = 80 }
  0x22   : > { %s440_s1 = sshll.u32 %s2383_s24, 4  ;;  %s441_s1 = int_to_ptr.vmem [resolvable:$true] %s440_s1 }
  0x23   : > { %2163 = dma.hbm_to_vmem [thread:$0]  (!%p2524_p12), %s439_s20, 4096, %s441_s1, [#allocation6], %s2378_s16, %s2378_s16, %s2379_s17  }
  0x26   : > { %2350 = dma.done.wait (%p2168_p9), [#allocation3], 5120  }
  0x27   : > { %2352 = vsyncadd (%p2168_p9), [#allocation3], 4294962176 }
  0x28   : > { %2354 = dma.done.wait (%p2168_p9), [#allocation6], 8704  }
  0x29   : > { %2356 = vsyncadd (%p2168_p9), [#allocation6], 4294958592  ;;  %p537_p13 = scmp.lt.s32.totalorder %s2485_s22, 1  ;;  %vm582_vm0 = vcmask 1043456   ;;  %v561_v0 = vld [vmem:[#allocation2 + $0x70] sm:$0xf]  ;;  %s1906_s16 = scalar_lea.hbm %s3153_s15, %s2485_s22 }
  0x2a   : > { %v562_v1 = vld [vmem:[#allocation2 + $0x78] sm:$0xf]  ;;  %2008 = vmatpush.msk.msra.mxu0 %vm582_vm0, %v561_v0  ;;  %v559_v3 = vld [vmem:[#allocation2 + $0x60] sm:$0xff]  ;;  %v560_v4 = vld [vmem:[#allocation2 + $0x68] sm:$0xff]  ;;  %vm567_vm1 = vcmask 1046528   ;;  %vm575_vm2 = vcmask 228352  }
  0x2b   : > { %s538_s4 = scalar_select %p537_p13, %s2485_s22, 1  ;;  %v553_v2 = vld [vmem:[#allocation2 + $0x38] sm:$0xf]  ;;  %2012 = vmatpush.msk.msra.mxu1 %vm582_vm0, %v562_v1  ;;  %v551_v5 = vld [vmem:[#allocation2 + $0x28] sm:$0xff]  ;;  %2136 = vmatpush.msk.msra.mxu2 %vm582_vm0, %v562_v1  ;;  %v557_v6 = vld [vmem:[#allocation2 + $0x50] sm:$0xff]  ;;  %vm714_vm3 = vcmask 1045504  }
  0x2c   : > { %2020 = vmatpush.msk.msra.mxu3 %vm582_vm0, %v553_v2  ;;  %v558_v7 = vld [vmem:[#allocation2 + $0x58] sm:$0xff]  ;;  %602 = vmatpush.msra.mxu0 %v559_v3  ;;  %v555_v9 = vld [vmem:[#allocation2 + $0x40] sm:$0xff]  ;;  %v556_v10 = vld [vmem:[#allocation2 + $0x48] sm:$0xff]  ;;  %vm801_vm4 = vcmask 1044480   ;;  %vm985_vm5 = vcmask 195584   ;;  %vm1111_vm6 = vcmask 130048  }
  0x2d   : > { %s2135_s1 = sshll.u32 %s538_s4, 5  ;;  %628 = vmatpush.msra.mxu1 %v560_v4  ;;  %v549_v8 = vld [vmem:[#allocation2 + $0x18] sm:$0xff]  ;;  %2137 = vmatpush.msra.mxu2 %v560_v4  ;;  %v547_v14 = vld [vmem:[#allocation2 + $0x8] sm:$0xff]  ;;  %v552_v22 = vld [vmem:[#allocation2 + $0x30] sm:$0xf]  ;;  %vm1357_vm7 = vcmask 588800  }
  0x2e   : > { %s2557_s21 = scalar_lea.vmem %s3138_s0, %s2135_s1  ;;  %692 = vmatpush.msra.mxu3 %v551_v5  ;;  %603 = vmatpush.msra.mxu0 %v557_v6  ;;  %v713_v20 = vld [vmem:[#allocation2 + $0xb8] sm:$0xf]  ;;  %v712_v23 = vld [vmem:[#allocation2 + $0xb0] sm:$0xf]  ;;  %v711_v25 = vld [vmem:[#allocation2 + $0xa8] sm:$0xff]  ;;  %vm1517_vm8 = vcmask 64512  }
  0x2f   : > { %v2562_v11 = vld [vmem:[%s2557_s21] sm:$0xff]  ;;  %v2565_v12 = vld [vmem:[%s2557_s21 + $0x8] sm:$0xff]  ;;  %v2568_v13 = vld [vmem:[%s2557_s21 + $0x10] sm:$0xff]  ;;  %629 = vmatpush.msra.mxu1 %v558_v7  ;;  %2138 = vmatpush.msra.mxu2 %v558_v7  ;;  %vm1691_vm9 = vcmask 523264   ;;  %vm1832_vm10 = vcmask 982016   ;;  %vm1869_vm11 = vcmask 687104  }
  0x30   : > { %v568_v15 = vrot.slane %v2562_v11, 1  ;;  %v569_v16 = vrot.slane %v2565_v12, 1  ;;  %v571_v17 = vrot.slane %v2568_v13, 1  ;;  %693 = vmatpush.msra.mxu3 %v549_v8  ;;  %604 = vmatpush.msra.mxu0 %v555_v9  ;;  %v2576_v21 = vld [vmem:[%s2557_s21 + $0x18] sm:$0xf]  ;;  %v550_v26 = vld [vmem:[#allocation2 + $0x20] sm:$0xff] }
  0x31   : > { %630 = vmatpush.msra.mxu1 %v556_v10  ;;  %2139 = vmatpush.msra.mxu2 %v556_v10  ;;  %v800_v24 = vld [vmem:[#allocation2 + $0xf8] sm:$0xf]  ;;  %v573_v27 = vrot.slane %v2576_v21, 1  ;;  %v710_v28 = vld [vmem:[#allocation2 + $0xa0] sm:$0xff]  ;;  %v798_v29 = vld [vmem:[#allocation2 + $0xe8] sm:$0xff]  ;;  %v715_v31 = vrot.slane %v2562_v11, 2 }
  0x32   : > { %v570_v18 = vsel %vm567_vm1, %v568_v15, %v569_v16  ;;  %v572_v19 = vsel %vm567_vm1, %v569_v16, %v571_v17  ;;  %694 = vmatpush.msra.mxu3 %v547_v14  ;;  %v709_v30 = vld [vmem:[#allocation2 + $0x98] sm:$0xff]  ;;  %v716_v32 = vrot.slane %v2565_v12, 2  ;;  %v548_v33 = vld [vmem:[#allocation2 + $0x10] sm:$0xff]  ;;  %2024 = vmatpush.msk.msrb.mxu0 %vm582_vm0, %v712_v23  ;;  %v707_v36 = vld [vmem:[#allocation2 + $0x88] sm:$0xff]  ;;  %v718_v45 = vrot.slane %v2568_v13, 2  ;;  %s535_s29 = sand.u32 1, %s2367_s19  }
  0x33   : > { %2009 = vmatmul.msk.f32.vlgmr.msra.gmra.mxu0 %vm575_vm2, %v570_v18  ;;  %2013 = vmatmul.msk.f32.vlgmr.msra.gmra.mxu1 %vm575_vm2, %v570_v18  ;;  %v708_v34 = vld [vmem:[#allocation2 + $0x90] sm:$0xff]  ;;  %v796_v35 = vld [vmem:[#allocation2 + $0xd8] sm:$0xff]  ;;  %v574_v37 = vsel %vm567_vm1, %v571_v17, %v573_v27  ;;  %v546_v39 = vld [vmem:[#allocation2] sm:$0xff]  ;;  %v802_v55 = vrot.slane %v2562_v11, 3  ;;  %v803_v56 = vrot.slane %v2565_v12, 3  ;;  %v720_v58 = vrot.slane %v2576_v21, 2 }
  0x34   : > { %2014 = vmatmul.msk.f32.vlgmr.msra.gmra.mxu2 %vm575_vm2, %v572_v19  ;;  %2021 = vmatmul.msk.f32.vlgmr.msra.gmra.mxu3 %vm575_vm2, %v2562_v11  ;;  %v717_v38 = vsel %vm714_vm3, %v715_v31, %v716_v32  ;;  %v706_v40 = vld [vmem:[#allocation2 + $0x80] sm:$0xff]  ;;  %v794_v41 = vld [vmem:[#allocation2 + $0xc8] sm:$0xff]  ;;  %v887_v42 = vld [vmem:[#allocation2 + $0x138] sm:$0xf]  ;;  %v719_v50 = vsel %vm714_vm3, %v716_v32, %v718_v45  ;;  %v805_v61 = vrot.slane %v2568_v13, 3  ;;  %v888_v62 = vrot.slane %v2562_v11, 4 }
  0x35   : > { %2028 = vmatpush.msk.msrb.mxu1 %vm582_vm0, %v713_v20  ;;  %2016 = vmatpush.msk.msrb.mxu2 %vm582_vm0, %v552_v22  ;;  %v799_v43 = vld [vmem:[#allocation2 + $0xf0] sm:$0xf]  ;;  %v885_v46 = vld [vmem:[#allocation2 + $0x128] sm:$0xff]  ;;  %v797_v47 = vld [vmem:[#allocation2 + $0xe0] sm:$0xff]  ;;  %v804_v59 = vsel %vm801_vm4, %v802_v55, %v803_v56  ;;  %v721_v60 = vsel %vm714_vm3, %v718_v45, %v720_v58  ;;  %v889_v63 = vrot.slane %v2565_v12, 4  ;;  %v807_v2 = vrot.slane %v2576_v21, 3 }
  0x36   : > { %2036 = vmatpush.msk.msrb.mxu3 %vm582_vm0, %v800_v24  ;;  %747 = vmatpush.msrb.mxu0 %v710_v28  ;;  %v886_v44 = vld [vmem:[#allocation2 + $0x130] sm:$0xf]  ;;  %v884_v48 = vld [vmem:[#allocation2 + $0x120] sm:$0xff]  ;;  %v883_v49 = vld [vmem:[#allocation2 + $0x118] sm:$0xff]  ;;  %v806_v0 = vsel %vm801_vm4, %v803_v56, %v805_v61  ;;  %v891_v3 = vrot.slane %v2568_v13, 4  ;;  %v893_v6 = vrot.slane %v2576_v21, 4 }
  0x37   : > { %773 = vmatpush.msrb.mxu1 %v711_v25  ;;  %666 = vmatpush.msrb.mxu2 %v550_v26  ;;  %v795_v51 = vld [vmem:[#allocation2 + $0xd0] sm:$0xff]  ;;  %v881_v52 = vld [vmem:[#allocation2 + $0x108] sm:$0xff]  ;;  %v793_v54 = vld [vmem:[#allocation2 + $0xc0] sm:$0xff]  ;;  %v890_v1 = vsel %vm582_vm0, %v888_v62, %v889_v63  ;;  %v808_v4 = vsel %vm801_vm4, %v805_v61, %v807_v2  ;;  %s3179_s20 = sld [smem:[#allocation21_spill]]  ;;  %s536_s24 = scalar_lea.vmem [#allocation8], %s535_s29 }
  0x38   : > { %860 = vmatpush.msrb.mxu3 %v798_v29  ;;  %748 = vmatpush.msrb.mxu0 %v708_v34  ;;  %v882_v53 = vld [vmem:[#allocation2 + $0x110] sm:$0xff]  ;;  %v880_v57 = vld [vmem:[#allocation2 + $0x100] sm:$0xff]  ;;  %v892_v5 = vsel %vm582_vm0, %v889_v63, %v891_v3  ;;  %v894_v7 = vsel %vm582_vm0, %v891_v3, %v893_v6  ;;  %s1908_s4 = sshll.u32 %s536_s24, 4  ;;  %s1910_s1 = sshll.u32 %s1906_s16, 4  ;;  %s1909_s4 = int_to_ptr.vmem [resolvable:$true] %s1908_s4  ;;  %s1911_s1 = int_to_ptr.hbm [resolvable:$true] %s1910_s1 }
  0x39   : > { %774 = vmatpush.msrb.mxu1 %v709_v30  ;;  %667 = vmatpush.msrb.mxu2 %v548_v33  ;;  %v983_v62 = vld [vmem:[%s3141_s3] sm:$0xff]  ;;  %s1898_s14 = scalar_lea.sflag [#allocation4], %s535_s29  ;;  %s2319_s18 = sshra.s32 %s1911_s1, 4  ;;  %s2320_s18 = int_to_ptr.hbm [resolvable:$true] %s2319_s18 }
  0x3a   : > { %861 = vmatpush.msrb.mxu3 %v796_v35  ;;  %749 = vmatpush.msrb.mxu0 %v706_v40  ;;  %v965_v40 = vld [vmem:[%s3140_s2] sm:$0x3]  ;;  %s2321_s21 = scalar_lea.hbm %s2320_s18, 1  ;;  %s2325_s28 = scalar_lea.hbm %s3153_s15, 2 }
  0x3b   : > { %775 = vmatpush.msrb.mxu1 %v707_v36  ;;  %2010 = vmatmul.msk.f32.gmra.mxu0 %vm575_vm2, %v572_v19  ;;  %v967_v6 = vperm.slane %v965_v40, 0  ;;  %p2322_p0 = scmp.ne.s32.totalorder %s2320_s18, %s2321_s21  ;;  %p2326_p3 = scmp.lt.s32.totalorder %s2320_s18, %s3153_s15 }
  0x3c   : > { %2015 = vmatmul.msk.f32.gmra.mxu2 %vm575_vm2, %v574_v37  ;;  %2022 = vmatmul.msk.f32.gmra.mxu3 %vm575_vm2, %v2565_v12  ;;  %p2327_p4 = scmp.lt.s32.totalorder %s2325_s28, %s2321_s21 }
  0x3d   : > { %2029 = vmatmul.msk.f32.vlgmr.msrb.gmra.mxu1 %vm575_vm2, %v717_v38  ;;  %668 = vmatpush.msrb.mxu2 %v546_v39  ;;  %p2323_p1 = pnand %p2322_p0, %p2502_p5 }
  0x3e   : > { %862 = vmatpush.msrb.mxu3 %v794_v41  ;;  %2044 = vmatpush.msk.msra.mxu1 %vm582_vm0, %v887_v42  ;;  %p2328_p7 = por %p2327_p4, %p2326_p3 }
  0x3f   : > { %2032 = vmatpush.msk.msra.mxu2 %vm582_vm0, %v799_v43  ;;  %2040 = vmatpush.msk.msra.mxu0 %vm582_vm0, %v886_v44  ;;  %p2324_p2 = pneg %p2323_p1 }
  0x40   : > { %946 = vmatpush.msra.mxu1 %v885_v46  ;;  %v968_v46 = vperm.slane %v965_v40, 1  ;;  %v1174_v40 = vld [vmem:[#allocation5 + $0xd8] sm:$0xff] }
  0x41   : > { %834 = vmatpush.msra.mxu2 %v797_v47  ;;  %920 = vmatpush.msra.mxu0 %v884_v48  ;;  %p2329_p8 = pnand %p2328_p7, %p2324_p2 }
  0x42   : > { %947 = vmatpush.msra.mxu1 %v883_v49 }
  0x43   : > { %2011 = vmatmul.msk.f32.gmra.mxu0 %vm575_vm2, %v574_v37  ;;  %835 = vmatpush.msra.mxu2 %v795_v51 }
  0x44   : > { %2017 = vmatmul.msk.f32.vlgmr.msrb.gmra.mxu2 %vm575_vm2, %v2562_v11  ;;  %2023 = vmatmul.msk.f32.gmra.mxu3 %vm575_vm2, %v2568_v13 }
  0x45   : > { %2030 = vmatmul.msk.f32.gmra.mxu1 %vm575_vm2, %v719_v50  ;;  %921 = vmatpush.msra.mxu0 %v882_v53 }
  0x46   : > { %948 = vmatpush.msra.mxu1 %v881_v52  ;;  %836 = vmatpush.msra.mxu2 %v793_v54 }
  0x47   : > { %922 = vmatpush.msra.mxu0 %v880_v57 }
  0x4b   : > { %2025 = vmatmul.msk.f32.vlgmr.msrb.gmra.mxu0 %vm575_vm2, %v717_v38 }
  0x4c   : > { %2018 = vmatmul.msk.f32.gmra.mxu2 %vm575_vm2, %v2565_v12  ;;  %2037 = vmatmul.msk.f32.vlgmr.msrb.gmra.mxu3 %vm575_vm2, %v804_v59 }
  0x4d   : > { %2031 = vmatmul.msk.f32.gmra.mxu1 %vm575_vm2, %v721_v60 }
  0x53   : > { %2026 = vmatmul.msk.f32.gmra.mxu0 %vm575_vm2, %v719_v50 }
  0x54   : > { %2019 = vmatmul.msk.f32.gmra.mxu2 %vm575_vm2, %v2568_v13  ;;  %2038 = vmatmul.msk.f32.gmra.mxu3 %vm575_vm2, %v806_v0 }
  0x55   : > { %2045 = vmatmul.msk.f32.vlgmr.msra.gmra.mxu1 %vm575_vm2, %v890_v1 }
  0x5b   : > { %2027 = vmatmul.msk.f32.gmra.mxu0 %vm575_vm2, %v721_v60 }
  0x5c   : > { %2033 = vmatmul.msk.f32.vlgmr.msra.gmra.mxu2 %vm575_vm2, %v804_v59  ;;  %2039 = vmatmul.msk.f32.gmra.mxu3 %vm575_vm2, %v808_v4 }
  0x5d   : > { %2046 = vmatmul.msk.f32.gmra.mxu1 %vm575_vm2, %v892_v5 }
  0x63   : > { %2041 = vmatmul.msk.f32.vlgmr.msra.gmra.mxu0 %vm575_vm2, %v890_v1 }
  0x64   : > { %2034 = vmatmul.msk.f32.gmra.mxu2 %vm575_vm2, %v806_v0 }
  0x65   : > { %2047 = vmatmul.msk.f32.gmra.mxu1 %vm575_vm2, %v894_v7 }
  0x6b   : > { %2042 = vmatmul.msk.f32.gmra.mxu0 %vm575_vm2, %v892_v5 }
  0x6c   : > { %2035 = vmatmul.msk.f32.gmra.mxu2 %vm575_vm2, %v808_v4 }
  0x73   : > { %2043 = vmatmul.msk.f32.gmra.mxu0 %vm575_vm2, %v894_v7 }
  0xb0   : > { %v606_v8 = vpop.f32.mrf.mxu0  ;;  %v632_v9 = vpop.f32.mrf.mxu1 }
  0xb7   : > { %v635_v10 = vpop.f32.mrf.mxu2  ;;  %v696_v11 = vpop.f32.mrf.mxu3 }
  0xb8   : > { %v609_v12 = vpop.f32.mrf.mxu0  ;;  %v697_v30 = vadd.f32 %v696_v11, %v632_v9  ;;  %v1108_v11 = vld [vmem:[#allocation5 + $0x78] sm:$0xff] }
  0xb9   : > { %1118 = vmatpush.msrb.mxu0 %v1108_v11 }
  0xba   : > { %v777_v13 = vpop.f32.mrf.mxu1 }
  0xbb   : > { %v787_v34 = vadd.f32 %v777_v13, %v697_v30  ;;  %v1100_v30 = vld [vmem:[#allocation5 + $0x38] sm:$0xff] }
  0xbf   : > { %v638_v14 = vpop.f32.mrf.mxu2  ;;  %v699_v15 = vpop.f32.mrf.mxu3 }
  0xc0   : > { %v612_v16 = vpop.f32.mrf.mxu0  ;;  %v700_v26 = vadd.f32 %v699_v15, %v635_v10  ;;  %v984_v10 = vld [vmem:[%s3141_s3 + $0x8] sm:$0xf] }
  0xc1   : > { %v1106_v15 = vld [vmem:[#allocation5 + $0x68] sm:$0xff] }
  0xc2   : > { %v780_v17 = vpop.f32.mrf.mxu1 }
  0xc3   : > { %v789_v33 = vadd.f32 %v780_v17, %v700_v26  ;;  %v1105_v17 = vld [vmem:[#allocation5 + $0x60] sm:$0xff]  ;;  %v1102_v26 = vld [vmem:[#allocation5 + $0x48] sm:$0xff] }
  0xc7   : > { %v670_v18 = vpop.f32.mrf.mxu2  ;;  %v702_v19 = vpop.f32.mrf.mxu3 }
  0xc8   : > { %v751_v20 = vpop.f32.mrf.mxu0  ;;  %v703_v31 = vadd.f32 %v702_v19, %v638_v14  ;;  %v671_v54 = vadd.f32 %v670_v18, %v606_v8  ;;  %v1104_v19 = vld [vmem:[#allocation5 + $0x58] sm:$0xff] }
  0xca   : > { %v783_v21 = vpop.f32.mrf.mxu1  ;;  %v786_v60 = vadd.f32 %v751_v20, %v671_v54  ;;  %v2052_v20 = vld [vmem:[%s3141_s3 + $0x10] sm:$0xff] }
  0xcb   : > { %v791_v36 = vadd.f32 %v783_v21, %v703_v31  ;;  %v2658_v21 = vld [vmem:[#allocation5 + $0x118] sm:$0xff] }
  0xcc   : > { %v2053_v31 = vld [vmem:[%s3141_s3 + $0x18] sm:$0xf] }
  0xcf   : > { %v673_v22 = vpop.f32.mrf.mxu2  ;;  %v864_v23 = vpop.f32.mrf.mxu3 }
  0xd0   : > { %v754_v24 = vpop.f32.mrf.mxu0  ;;  %v874_v37 = vadd.f32 %v864_v23, %v787_v34  ;;  %v674_v50 = vadd.f32 %v673_v22, %v609_v12  ;;  %v1107_v12 = vld [vmem:[#allocation5 + $0x70] sm:$0xff]  ;;  %v2662_v23 = vld [vmem:[#allocation5 + $0x88] sm:$0xff] }
  0xd1   : > { %1119 = vmatpush.msrb.mxu0 %v1107_v12  ;;  %v1103_v22 = vld [vmem:[#allocation5 + $0x50] sm:$0xff]  ;;  %1155 = vmatpush.msrb.mxu1 %v2662_v23 }
  0xd2   : > { %v950_v25 = vpop.f32.mrf.mxu1  ;;  %v788_v57 = vadd.f32 %v754_v24, %v674_v50  ;;  %v2664_v24 = vld [vmem:[#allocation5 + $0x110] sm:$0xff]  ;;  %v1166_v50 = vld [vmem:[#allocation5 + $0x98] sm:$0xff] }
  0xd3   : > { %v960_v45 = vadd.f32 %v950_v25, %v874_v37  ;;  %1120 = vmatpush.msrb.mxu0 %v1106_v15  ;;  %v2666_v25 = vld [vmem:[#allocation5 + $0x80] sm:$0xff]  ;;  %v1177_v34 = vld [vmem:[#allocation5 + $0xf0] sm:$0xff] }
  0xd4   : > { %1156 = vmatpush.msrb.mxu1 %v2666_v25  ;;  %v1097_v37 = vld [vmem:[#allocation5 + $0x20] sm:$0xff] }
  0xd5   : > { %v972_v51 = vadd.f32 %v968_v46, %v960_v45  ;;  %1121 = vmatpush.msrb.mxu0 %v1105_v17  ;;  %v1171_v45 = vld [vmem:[#allocation5 + $0xc0] sm:$0xff] }
  0xd6   : > { %1237 = vmatpush.msra.mxu1 %v1108_v11  ;;  %v2069_v11 = vld [vmem:[%s3143_s5 + $0x60] sm:$0xff] }
  0xd7   : > { %v676_v27 = vpop.f32.mrf.mxu2  ;;  %v867_v28 = vpop.f32.mrf.mxu3  ;;  %v978_v59 = vmax.f32 %v972_v51, 0.0  ;;  %1122 = vmatpush.msrb.mxu0 %v1104_v19  ;;  %v1093_v51 = vld [vmem:[#allocation5] sm:$0xff] }
  0xd8   : > { %v757_v29 = vpop.f32.mrf.mxu0  ;;  %v876_v35 = vadd.f32 %v867_v28, %v789_v33  ;;  %v677_v58 = vadd.f32 %v676_v27, %v612_v16  ;;  %v1180_v27 = vld [vmem:[#allocation5 + $0x108] sm:$0xff]  ;;  %v1101_v28 = vld [vmem:[#allocation5 + $0x40] sm:$0xff]  ;;  %v1099_v33 = vld [vmem:[#allocation5 + $0x30] sm:$0xff]  ;;  %1238 = vmatpush.msra.mxu1 %v1107_v12 }
  0xd9   : > { %1123 = vmatpush.msrb.mxu0 %v1103_v22  ;;  %v1335_v12 = vld [vmem:[%s3143_s5 + $0x10] sm:$0xff] }
  0xda   : > { %v953_v32 = vpop.f32.mrf.mxu1  ;;  %v790_v63 = vadd.f32 %v757_v29, %v677_v58  ;;  %v1179_v29 = vld [vmem:[#allocation5 + $0x100] sm:$0xff]  ;;  %1239 = vmatpush.msra.mxu1 %v1106_v15  ;;  %v2068_v15 = vld [vmem:[%s3143_s5 + $0x58] sm:$0xff] }
  0xdb   : > { %v962_v43 = vadd.f32 %v953_v32, %v876_v35  ;;  %1124 = vmatpush.msrb.mxu0 %v1102_v26  ;;  %v1178_v32 = vld [vmem:[#allocation5 + $0xf8] sm:$0xff]  ;;  %v1098_v35 = vld [vmem:[#allocation5 + $0x28] sm:$0xff] }
  0xdc   : > { %1240 = vmatpush.msra.mxu1 %v1105_v17  ;;  %v2083_v17 = vld [vmem:[%s3143_s5 + $0xc0] sm:$0xff] }
  0xdd   : > { %v974_v48 = vadd.f32 %v968_v46, %v962_v43  ;;  %1125 = vmatpush.msrb.mxu0 %v1101_v28  ;;  %v1094_v43 = vld [vmem:[#allocation5 + $0x8] sm:$0xff] }
  0xde   : > { %1241 = vmatpush.msra.mxu1 %v1104_v19  ;;  %v2067_v19 = vld [vmem:[%s3143_s5 + $0x50] sm:$0xff] }
  0xdf   : > { %v838_v38 = vpop.f32.mrf.mxu2  ;;  %v870_v39 = vpop.f32.mrf.mxu3  ;;  %v980_v56 = vmax.f32 %v974_v48, 0.0  ;;  %1126 = vmatpush.msrb.mxu0 %v1100_v30  ;;  %v1168_v48 = vld [vmem:[#allocation5 + $0xa8] sm:$0xff] }
  0xe0   : > { %v878_v41 = vadd.f32 %v870_v39, %v791_v36  ;;  %v924_v42 = vpop.f32.mrf.mxu0  ;;  %v873_v0 = vadd.f32 %v838_v38, %v786_v60  ;;  %v1176_v36 = vld [vmem:[#allocation5 + $0xe8] sm:$0xff]  ;;  %v1175_v38 = vld [vmem:[#allocation5 + $0xe0] sm:$0xff]  ;;  %v1096_v39 = vld [vmem:[#allocation5 + $0x18] sm:$0xff]  ;;  %1242 = vmatpush.msra.mxu1 %v1103_v22 }
  0xe1   : > { %1127 = vmatpush.msrb.mxu0 %v1099_v33  ;;  %v2092_v22 = vld [vmem:[%s3143_s5 + $0x100] sm:$0xff] }
  0xe2   : > { %v956_v44 = vpop.f32.mrf.mxu1  ;;  %v959_v5 = vadd.f32 %v924_v42, %v873_v0  ;;  %v1173_v42 = vld [vmem:[#allocation5 + $0xd0] sm:$0xff]  ;;  %1243 = vmatpush.msra.mxu1 %v1102_v26  ;;  %v2073_v0 = vld [vmem:[%s3143_s5 + $0x80] sm:$0xff] }
  0xe3   : > { %v964_v47 = vadd.f32 %v956_v44, %v878_v41  ;;  %1128 = vmatpush.msrb.mxu0 %v1098_v35  ;;  %v1095_v41 = vld [vmem:[#allocation5 + $0x10] sm:$0xff]  ;;  %v1172_v44 = vld [vmem:[#allocation5 + $0xc8] sm:$0xff] }
  0xe4   : > { %v971_v13 = vadd.f32 %v967_v6, %v959_v5  ;;  %1244 = vmatpush.msra.mxu1 %v1101_v28  ;;  %v1337_v5 = vld [vmem:[%s3143_s5 + $0x20] sm:$0xff]  ;;  %v2081_v26 = vld [vmem:[%s3143_s5 + $0xb0] sm:$0xff] }
  0xe5   : > { %v976_v49 = vadd.f32 %v968_v46, %v964_v47  ;;  %1129 = vmatpush.msrb.mxu0 %v1097_v37  ;;  %v1170_v46 = vld [vmem:[#allocation5 + $0xb8] sm:$0xff]  ;;  %v1169_v47 = vld [vmem:[#allocation5 + $0xb0] sm:$0xff]  ;;  %v2105_v28 = vld [vmem:[%s3143_s5 + $0x160] sm:$0xff] }
  0xe6   : > { %v977_v18 = vmax.f32 %v971_v13, 0.0  ;;  %1245 = vmatpush.msra.mxu1 %v1100_v30  ;;  %v2084_v13 = vld [vmem:[%s3143_s5 + $0xc8] sm:$0xff] }
  0xe7   : > { %v982_v52 = vmax.f32 %v976_v49, 0.0  ;;  %v841_v53 = vpop.f32.mrf.mxu2  ;;  %1130 = vmatpush.msrb.mxu0 %v1096_v39  ;;  %v1167_v49 = vld [vmem:[#allocation5 + $0xa0] sm:$0xff]  ;;  %v2080_v30 = vld [vmem:[%s3143_s5 + $0xa8] sm:$0xff] }
  0xe8   : > { %v927_v55 = vpop.f32.mrf.mxu0  ;;  %v875_v61 = vadd.f32 %v841_v53, %v788_v57  ;;  %1246 = vmatpush.msra.mxu1 %v1099_v33  ;;  %v2079_v33 = vld [vmem:[%s3143_s5 + $0xa0] sm:$0xff] }
  0xe9   : > { %1028 = vmatpush.msra.mxu3 %v982_v52  ;;  %1131 = vmatpush.msrb.mxu0 %v1095_v41 }
  0xea   : > { %v961_v2 = vadd.f32 %v927_v55, %v875_v61  ;;  %1247 = vmatpush.msra.mxu1 %v1098_v35  ;;  %v1341_v61 = vld [vmem:[%s3143_s5 + $0x40] sm:$0xff]  ;;  %v2103_v35 = vld [vmem:[%s3143_s5 + $0x150] sm:$0xff] }
  0xeb   : > { %1029 = vmatpush.msra.mxu3 %v980_v56  ;;  %1132 = vmatpush.msrb.mxu0 %v1094_v43 }
  0xec   : > { %v973_v8 = vadd.f32 %v967_v6, %v961_v2  ;;  %1248 = vmatpush.msra.mxu1 %v1097_v37  ;;  %v2072_v2 = vld [vmem:[%s3143_s5 + $0x78] sm:$0xff]  ;;  %v2088_v37 = vld [vmem:[%s3143_s5 + $0xe0] sm:$0xff] }
  0xed   : > { %1030 = vmatpush.msra.mxu3 %v978_v59  ;;  %1133 = vmatpush.msrb.mxu0 %v1093_v51 }
  0xee   : > { %2050 = vmatmul.msk.f32.vlgmr.msra.gmra.mxu3 %vm985_vm5, %v983_v62  ;;  %v979_v16 = vmax.f32 %v973_v8, 0.0  ;;  %1249 = vmatpush.msra.mxu1 %v1096_v39  ;;  %v1336_v8 = vld [vmem:[%s3143_s5 + $0x18] sm:$0xff]  ;;  %v2077_v39 = vld [vmem:[%s3143_s5 + $0x90] sm:$0xff] }
  0xef   : > { %1083 = vmatpush.msrb.mxu3 %v982_v52  ;;  %v844_v1 = vpop.f32.mrf.mxu2  ;;  %v1165_v52 = vld [vmem:[#allocation5 + $0x90] sm:$0xff]  ;;  %1274 = vmatpush.msra.mxu0 %v2662_v23 }
  0xf0   : > { %v877_v3 = vadd.f32 %v844_v1, %v790_v63  ;;  %v930_v4 = vpop.f32.mrf.mxu0  ;;  %1250 = vmatpush.msra.mxu1 %v1095_v41  ;;  %v1340_v63 = vld [vmem:[%s3143_s5 + $0x38] sm:$0xff]  ;;  %v1339_v1 = vld [vmem:[%s3143_s5 + $0x30] sm:$0xff] }
  0xf1   : > { %1084 = vmatpush.msrb.mxu3 %v980_v56  ;;  %1275 = vmatpush.msra.mxu0 %v2666_v25  ;;  %v2066_v25 = vld [vmem:[%s3143_s5 + $0x48] sm:$0xff] }
  0xf2   : > { %v963_v7 = vadd.f32 %v930_v4, %v877_v3  ;;  %1251 = vmatpush.msra.mxu1 %v1094_v43  ;;  %v1338_v3 = vld [vmem:[%s3143_s5 + $0x28] sm:$0xff]  ;;  %v2071_v4 = vld [vmem:[%s3143_s5 + $0x70] sm:$0xff] }
  0xf3   : > { %1085 = vmatpush.msrb.mxu3 %v978_v59 }
  0xf4   : > { %v975_v9 = vadd.f32 %v967_v6, %v963_v7  ;;  %1252 = vmatpush.msra.mxu1 %v1093_v51  ;;  %v2070_v7 = vld [vmem:[%s3143_s5 + $0x68] sm:$0xff] }
  0xf5   : > { %1220 = vmatpush.msra.mxu3 %v2658_v21 }
  0xf6   : > { %v981_v14 = vmax.f32 %v975_v9, 0.0  ;;  %2051 = vmatmul.msk.f32.gmra.mxu3 %vm985_vm5, %v984_v10  ;;  %v2085_v9 = vld [vmem:[%s3143_s5 + $0xd0] sm:$0xff] }
  0xf7   : > { %1221 = vmatpush.msra.mxu3 %v2664_v24 }
  0xf8   : > { %1005 = vmatpush.msrb.mxu2 %v981_v14 }
  0xfa   : > { %1006 = vmatpush.msrb.mxu2 %v979_v16 }
  0xfc   : > { %1007 = vmatpush.msrb.mxu2 %v977_v18 }
  0xfd   : > { %2048 = vmatmul.msk.f32.vlgmr.msrb.gmra.mxu2 %vm985_vm5, %v983_v62  ;;  %v2074_v62 = vld [vmem:[%s3143_s5 + $0x88] sm:$0xff] }
  0xfe   : > { %1060 = vmatpush.msra.mxu2 %v981_v14  ;;  %2056 = vmatmul.msk.f32.vlgmr.msrb.gmra.mxu3 %vm985_vm5, %v2052_v20  ;;  %v2094_v14 = vld [vmem:[%s3143_s5 + $0x110] sm:$0xff] }
  0xff   : > { %1283 = vmatpush.msrb.mxu3 %v1180_v27 }
 0x100   : > { %1061 = vmatpush.msra.mxu2 %v979_v16  ;;  %v1334_v16 = vld [vmem:[%s3143_s5 + $0x8] sm:$0xff] }
 0x101   : > { %1284 = vmatpush.msrb.mxu3 %v1179_v29 }
 0x102   : > { %1062 = vmatpush.msra.mxu2 %v977_v18  ;;  %v2093_v18 = vld [vmem:[%s3143_s5 + $0x108] sm:$0xff] }
 0x103   : > { %1285 = vmatpush.msrb.mxu3 %v1178_v32 }
 0x104   : > { %1183 = vmatpush.msrb.mxu2 %v1180_v27  ;;  %v2091_v27 = vld [vmem:[%s3143_s5 + $0xf8] sm:$0xff] }
 0x105   : > { %2049 = vmatmul.msk.f32.gmra.mxu2 %vm985_vm5, %v984_v10  ;;  %1286 = vmatpush.msrb.mxu3 %v1177_v34  ;;  %v2095_v10 = vld [vmem:[%s3143_s5 + $0x118] sm:$0xff] }
 0x106   : > { %1184 = vmatpush.msrb.mxu2 %v1179_v29  ;;  %2057 = vmatmul.msk.f32.gmra.mxu3 %vm985_vm5, %v2053_v31 }
 0x107   : > { %1287 = vmatpush.msrb.mxu3 %v1176_v36 }
 0x108   : > { %1185 = vmatpush.msrb.mxu2 %v1178_v32  ;;  %v2104_v32 = vld [vmem:[%s3143_s5 + $0x158] sm:$0xff] }
 0x109   : > { %1288 = vmatpush.msrb.mxu3 %v1175_v38 }
 0x10a   : > { %1186 = vmatpush.msrb.mxu2 %v1177_v34  ;;  %v2089_v34 = vld [vmem:[%s3143_s5 + $0xe8] sm:$0xff] }
 0x10b   : > { %1289 = vmatpush.msrb.mxu3 %v1174_v40 }
 0x10c   : > { %1187 = vmatpush.msrb.mxu2 %v1176_v36  ;;  %v2078_v36 = vld [vmem:[%s3143_s5 + $0x98] sm:$0xff] }
 0x10d   : > { %2054 = vmatmul.msk.f32.vlgmr.msra.gmra.mxu2 %vm985_vm5, %v2052_v20  ;;  %1290 = vmatpush.msrb.mxu3 %v1173_v42  ;;  %v1333_v20 = vld [vmem:[%s3143_s5] sm:$0xff] }
 0x10e   : > { %1188 = vmatpush.msrb.mxu2 %v1175_v38  ;;  %v2102_v38 = vld [vmem:[%s3143_s5 + $0x148] sm:$0xff] }
 0x10f   : > { %1291 = vmatpush.msrb.mxu3 %v1172_v44 }
 0x110   : > { %1189 = vmatpush.msrb.mxu2 %v1174_v40  ;;  %v2087_v40 = vld [vmem:[%s3143_s5 + $0xd8] sm:$0xff] }
 0x111   : > { %1292 = vmatpush.msrb.mxu3 %v1171_v45 }
 0x112   : > { %1190 = vmatpush.msrb.mxu2 %v1173_v42  ;;  %v2101_v42 = vld [vmem:[%s3143_s5 + $0x140] sm:$0xff] }
 0x113   : > { %1293 = vmatpush.msrb.mxu3 %v1170_v46 }
 0x114   : > { %1191 = vmatpush.msrb.mxu2 %v1172_v44  ;;  %v2100_v44 = vld [vmem:[%s3143_s5 + $0x138] sm:$0xff] }
 0x115   : > { %2055 = vmatmul.msk.f32.gmra.mxu2 %vm985_vm5, %v2053_v31  ;;  %1294 = vmatpush.msrb.mxu3 %v1169_v47  ;;  %v2090_v31 = vld [vmem:[%s3143_s5 + $0xf0] sm:$0xff] }
 0x116   : > { %1192 = vmatpush.msrb.mxu2 %v1171_v45 }
 0x117   : > { %1295 = vmatpush.msrb.mxu3 %v1168_v48 }
 0x118   : > { %1193 = vmatpush.msrb.mxu2 %v1170_v46  ;;  %v2099_v46 = vld [vmem:[%s3143_s5 + $0x130] sm:$0xff] }
 0x119   : > { %1296 = vmatpush.msrb.mxu3 %v1167_v49 }
 0x11a   : > { %1194 = vmatpush.msrb.mxu2 %v1169_v47  ;;  %v2098_v47 = vld [vmem:[%s3143_s5 + $0x128] sm:$0xff] }
 0x11b   : > { %1297 = vmatpush.msrb.mxu3 %v1166_v50 }
 0x11c   : > { %1195 = vmatpush.msrb.mxu2 %v1168_v48 }
 0x11d   : > { %1298 = vmatpush.msrb.mxu3 %v1165_v52 }
 0x11e   : > { %1196 = vmatpush.msrb.mxu2 %v1167_v49  ;;  %v2097_v49 = vld [vmem:[%s3143_s5 + $0x120] sm:$0xff] }
 0x120   : > { %1197 = vmatpush.msrb.mxu2 %v1166_v50 }
 0x122   : > { %1198 = vmatpush.msrb.mxu2 %v1165_v52 }
 0x124   : > { %1367 = vmatpush.msra.mxu2 %v2074_v62 }
 0x126   : > { %1368 = vmatpush.msra.mxu2 %v2073_v0 }
 0x128   : > { %1369 = vmatpush.msra.mxu2 %v2072_v2 }
 0x12a   : > { %1370 = vmatpush.msra.mxu2 %v2071_v4 }
 0x12c   : > { %1371 = vmatpush.msra.mxu2 %v2070_v7 }
 0x12e   : > { %1372 = vmatpush.msra.mxu2 %v2069_v11 }
 0x130   : > { %1373 = vmatpush.msra.mxu2 %v2068_v15 }
 0x132   : > { %1374 = vmatpush.msra.mxu2 %v2067_v19 }
 0x134   : > { %1375 = vmatpush.msra.mxu2 %v2066_v25  ;;  %v2871_v25 = vld [vmem:[%s3146_s8 + $0x68] sm:$0xff] }
 0x171   : > { %v1032_v53 = vpop.f32.mrf.mxu3 }
 0x172   : > { %2060 = vmatmul.msk.f32.vlgmr.msra.gmra.mxu3 %vm1111_vm6, %v1032_v53  ;;  %2058 = vmatmul.msk.f32.vlgmr.msrb.gmra.mxu1 %vm1111_vm6, %v1032_v53 }
 0x173   : > { %1389 = vmatpush.msrb.mxu1 %v1341_v61  ;;  %1460 = vmatpush.msra.mxu3 %v2095_v10 }
 0x175   : > { %1390 = vmatpush.msrb.mxu1 %v1340_v63  ;;  %1461 = vmatpush.msra.mxu3 %v2094_v14 }
 0x177   : > { %1391 = vmatpush.msrb.mxu1 %v1339_v1  ;;  %1462 = vmatpush.msra.mxu3 %v2093_v18 }
 0x179   : > { %v1035_v54 = vpop.f32.mrf.mxu3  ;;  %1392 = vmatpush.msrb.mxu1 %v1338_v3  ;;  %1463 = vmatpush.msra.mxu3 %v2092_v22  ;;  %v2856_v22 = vld [vmem:[%s3146_s8 + $0xf0] sm:$0xff] }
 0x17a   : > { %2061 = vmatmul.msk.f32.gmra.mxu3 %vm1111_vm6, %v1035_v54  ;;  %2059 = vmatmul.msk.f32.gmra.mxu1 %vm1111_vm6, %v1035_v54 }
 0x17b   : > { %1393 = vmatpush.msrb.mxu1 %v1337_v5  ;;  %1464 = vmatpush.msra.mxu3 %v2091_v27  ;;  %v2883_v27 = vld [vmem:[%s3146_s8 + $0x60] sm:$0xff] }
 0x17d   : > { %1394 = vmatpush.msrb.mxu1 %v1336_v8  ;;  %1465 = vmatpush.msra.mxu3 %v2090_v31  ;;  %v2907_v31 = vld [vmem:[%s3146_s8 + $0x50] sm:$0xff] }
 0x17f   : > { %1395 = vmatpush.msrb.mxu1 %v1335_v12  ;;  %1466 = vmatpush.msra.mxu3 %v2089_v34  ;;  %v2926_v34 = vld [vmem:[%s3146_s8 + $0xc0] sm:$0xff] }
 0x180   : > { %v1009_v55 = vpop.f32.mrf.mxu2 }
 0x181   : > { %1134 = vmatmul.f32.vlgmr.msrb.gmra.mxu0 %v1009_v55  ;;  %1199 = vmatmul.f32.vlgmr.msrb.gmra.mxu2 %v1009_v55  ;;  %v1087_v57 = vpop.f32.mrf.mxu3 }
 0x182   : > { %1320 = vmatpush.msrb.mxu0 %v2658_v21  ;;  %1396 = vmatpush.msrb.mxu1 %v1334_v16  ;;  %v2082_v21 = vld [vmem:[%s3143_s5 + $0xb8] sm:$0xff] }
 0x183   : > { %1496 = vmatpush.msrb.mxu2 %v2105_v28  ;;  %1467 = vmatpush.msra.mxu3 %v2088_v37  ;;  %v2890_v28 = vld [vmem:[%s3146_s8 + $0xd8] sm:$0xff] }
 0x184   : > { %1321 = vmatpush.msrb.mxu0 %v2664_v24  ;;  %1397 = vmatpush.msrb.mxu1 %v1333_v20  ;;  %v2844_v20 = vld [vmem:[%s3146_s8 + $0xf8] sm:$0xff] }
 0x185   : > { %1497 = vmatpush.msrb.mxu2 %v2104_v32  ;;  %1468 = vmatpush.msra.mxu3 %v2087_v40  ;;  %v2914_v32 = vld [vmem:[%s3146_s8 + $0xc8] sm:$0xff]  ;;  %v2943_v37 = vld [vmem:[%s3146_s8 + $0x38] sm:$0xff]  ;;  %v2116_v40 = vld [vmem:[%s3146_s8 + $0xb0] sm:$0xff] }
 0x187   : > { %1498 = vmatpush.msrb.mxu2 %v2103_v35  ;;  %v2931_v35 = vld [vmem:[%s3146_s8 + $0x40] sm:$0xff] }
 0x188   : > { %v1012_v56 = vpop.f32.mrf.mxu2 }
 0x189   : > { %1137 = vmatmul.f32.gmra.mxu0 %v1012_v56  ;;  %1202 = vmatmul.f32.gmra.mxu2 %v1012_v56  ;;  %v1090_v59 = vpop.f32.mrf.mxu3 }
 0x18a   : > { %1499 = vmatpush.msrb.mxu2 %v2102_v38 }
 0x18c   : > { %1500 = vmatpush.msrb.mxu2 %v2101_v42 }
 0x18e   : > { %1501 = vmatpush.msrb.mxu2 %v2100_v44  ;;  %v2115_v44 = vld [vmem:[%s3146_s8 + $0xa8] sm:$0xff] }
 0x190   : > { %v1064_v58 = vpop.f32.mrf.mxu2  ;;  %1502 = vmatpush.msrb.mxu2 %v2099_v46 }
 0x191   : > { %2062 = vmatmul.msk.f32.vlgmr.msra.gmra.mxu0 %vm1111_vm6, %v1087_v57  ;;  %1299 = vmatmul.f32.vlgmr.msrb.gmra.mxu3 %v1064_v58 }
 0x192   : > { %1253 = vmatmul.f32.vlgmr.msra.gmra.mxu1 %v1064_v58  ;;  %1424 = vmatpush.msra.mxu0 %v2085_v9 }
 0x193   : > { %1503 = vmatpush.msrb.mxu2 %v2098_v47  ;;  %1619 = vmatpush.msrb.mxu3 %v2844_v20  ;;  %v2114_v47 = vld [vmem:[%s3146_s8 + $0xa0] sm:$0xff] }
 0x194   : > { %1425 = vmatpush.msra.mxu0 %v2084_v13 }
 0x195   : > { %1504 = vmatpush.msrb.mxu2 %v2097_v49  ;;  %1620 = vmatpush.msrb.mxu3 %v2856_v22 }
 0x196   : > { %1426 = vmatpush.msra.mxu0 %v2083_v17 }
 0x198   : > { %v1067_v60 = vpop.f32.mrf.mxu2  ;;  %1427 = vmatpush.msra.mxu0 %v2082_v21  ;;  %v2849_v21 = vld [vmem:[%s3146_s8 + $0x78] sm:$0xff] }
 0x199   : > { %2063 = vmatmul.msk.f32.gmra.mxu0 %vm1111_vm6, %v1090_v59  ;;  %1302 = vmatmul.f32.gmra.mxu3 %v1067_v60 }
 0x19a   : > { %1256 = vmatmul.f32.gmra.mxu1 %v1067_v60  ;;  %1428 = vmatpush.msra.mxu0 %v2081_v26  ;;  %v2878_v26 = vld [vmem:[%s3146_s8 + $0xe0] sm:$0xff] }
 0x19c   : > { %1429 = vmatpush.msra.mxu0 %v2080_v30  ;;  %v2902_v30 = vld [vmem:[%s3146_s8 + $0xd0] sm:$0xff] }
 0x19e   : > { %1430 = vmatpush.msra.mxu0 %v2079_v33  ;;  %v2919_v33 = vld [vmem:[%s3146_s8 + $0x48] sm:$0xff] }
 0x1a0   : > { %1431 = vmatpush.msra.mxu0 %v2078_v36  ;;  %v2938_v36 = vld [vmem:[%s3146_s8 + $0xb8] sm:$0xff] }
 0x1a1   : > { %2064 = vmatmul.msk.f32.vlgmr.msrb.gmra.mxu0 %vm1111_vm6, %v1087_v57 }
 0x1a2   : > { %1432 = vmatpush.msra.mxu0 %v2077_v39 }
 0x1a9   : > { %2065 = vmatmul.msk.f32.gmra.mxu0 %vm1111_vm6, %v1090_v59 }
 0x1ef   : > { %v1158_v24 = vpop.f32.mrf.mxu1 }
 0x1f5   : > { %v1223_v29 = vpop.f32.mrf.mxu3 }
 0x1f7   : > { %v1161_v43 = vpop.f32.mrf.mxu1 }
 0x1fd   : > { %v1226_v45 = vpop.f32.mrf.mxu3 }
 0x1fe   : > { %v2718_v6 = vpop.f32.mrf.mxu0 }
 0x1ff   : > { %v1159_v55 = vadd.f32 %v1158_v24, %v2718_v6  ;;  %v2866_v24 = vld [vmem:[%s3146_s8 + $0xe8] sm:$0xff] }
 0x200   : > { %1621 = vmatpush.msrb.mxu3 %v2866_v24 }
 0x202   : > { %1622 = vmatpush.msrb.mxu3 %v2878_v26 }
 0x204   : > { %v1200_v50 = vpop.f32.mrf.mxu2  ;;  %1623 = vmatpush.msrb.mxu3 %v2890_v28 }
 0x205   : > { %v1224_v53 = vadd.f32 %v1223_v29, %v1200_v50  ;;  %v2895_v29 = vld [vmem:[%s3146_s8 + $0x58] sm:$0xff] }
 0x206   : > { %v2768_v23 = vpop.f32.mrf.mxu0  ;;  %1624 = vmatpush.msrb.mxu3 %v2902_v30  ;;  %v2113_v50 = vld [vmem:[%s3146_s8 + $0x98] sm:$0xff] }
 0x207   : > { %v1229_v58 = vmax.f32 %v1159_v55, %v1224_v53  ;;  %v1162_v2 = vadd.f32 %v1161_v43, %v2768_v23  ;;  %v2861_v23 = vld [vmem:[%s3146_s8 + $0x70] sm:$0xff]  ;;  %v2214_v53 = vld [vmem:[%s3144_s6] ss:$0 sm:$0xff] }
 0x208   : > { %1625 = vmatpush.msrb.mxu3 %v2914_v32  ;;  %v2112_v55 = vld [vmem:[%s3146_s8 + $0x90] sm:$0xff] }
 0x20a   : > { %1626 = vmatpush.msrb.mxu3 %v2926_v34 }
 0x20c   : > { %v1203_v60 = vpop.f32.mrf.mxu2  ;;  %1627 = vmatpush.msrb.mxu3 %v2938_v36 }
 0x20d   : > { %v1227_v0 = vadd.f32 %v1226_v45, %v1203_v60  ;;  %v1571_v45 = vld [vmem:[%s3146_s8 + $0x28] sm:$0xff] }
 0x20e   : > { %v1277_v41 = vpop.f32.mrf.mxu0  ;;  %1628 = vmatpush.msrb.mxu3 %v2116_v40 }
 0x20f   : > { %v1254_v51 = vpop.f32.mrf.mxu1  ;;  %v1230_v5 = vmax.f32 %v1162_v2, %v1227_v0  ;;  %v2110_v0 = vld [vmem:[%s3146_s8 + $0x80] sm:$0xff]  ;;  %v1724_v2 = vld [vmem:[#allocation7 + $0x78] sm:$0xff] }
 0x210   : > { %v1278_v56 = vadd.f32 %v1277_v41, %v1254_v51  ;;  %v1572_v41 = vld [vmem:[%s3146_s8 + $0x30] sm:$0xff]  ;;  %1629 = vmatpush.msrb.mxu3 %v2115_v44  ;;  %v1569_v51 = vld [vmem:[%s3146_s8 + $0x18] sm:$0xff] }
 0x212   : > { %1630 = vmatpush.msrb.mxu3 %v2114_v47 }
 0x214   : > { %v1300_v52 = vpop.f32.mrf.mxu3  ;;  %1631 = vmatpush.msrb.mxu3 %v2113_v50 }
 0x216   : > { %v1280_v48 = vpop.f32.mrf.mxu0  ;;  %1632 = vmatpush.msrb.mxu3 %v2112_v55 }
 0x217   : > { %v1257_v62 = vpop.f32.mrf.mxu1 }
 0x218   : > { %v1281_v3 = vadd.f32 %v1280_v48, %v1257_v62  ;;  %v1570_v48 = vld [vmem:[%s3146_s8 + $0x20] sm:$0xff] }
 0x219   : > { %v1516_v62 = vld [vmem:[%s3145_s7] sm:$0xf] }
 0x21c   : > { %v1303_v63 = vpop.f32.mrf.mxu3 }
 0x21e   : > { %v1323_v54 = vpop.f32.mrf.mxu0 }
 0x21f   : > { %v1324_v57 = vadd.f32 %v1323_v54, %v1300_v52 }
 0x221   : > { %v1329_v59 = vmax.f32 %v1278_v56, %v1324_v57  ;;  %v1568_v56 = vld [vmem:[%s3146_s8 + $0x10] sm:$0xff] }
 0x223   : > { %v1331_v61 = vmax.f32 %v1229_v58, %v1329_v59  ;;  %v2111_v58 = vld [vmem:[%s3146_s8 + $0x88] sm:$0xff] }
 0x224   : > { %v1567_v59 = vld [vmem:[%s3146_s8 + $0x8] sm:$0xff]  ;;  %1633 = vmatpush.msrb.mxu3 %v2111_v58 }
 0x225   : > { %2076 = vmatmul.msk.f32.vlgmr.msrb.gmra.mxu1 %vm1357_vm7, %v1331_v61  ;;  %v1354_v8 = vrot.slane %v1331_v61, 1  ;;  %v1412_v9 = vrot.slane %v1331_v61, 2  ;;  %v1448_v12 = vrot.slane %v1331_v61, 3  ;;  %v1484_v18 = vrot.slane %v1331_v61, 4 }
 0x226   : > { %v1326_v1 = vpop.f32.mrf.mxu0  ;;  %1634 = vmatpush.msrb.mxu3 %v2110_v0 }
 0x227   : > { %v1327_v4 = vadd.f32 %v1326_v1, %v1303_v63  ;;  %v2108_v63 = vld [vmem:[%s3145_s7 + $0x4] sm:$0xf] }
 0x228   : > { %v1566_v1 = vld [vmem:[%s3146_s8] sm:$0xff] }
 0x229   : > { %v1330_v7 = vmax.f32 %v1281_v3, %v1327_v4  ;;  %v1723_v3 = vld [vmem:[#allocation7 + $0x70] sm:$0xff]  ;;  %v1757_v4 = vld [vmem:[#allocation7 + $0xb8] sm:$0xff] }
 0x22b   : > { %v1332_v6 = vmax.f32 %v1230_v5, %v1330_v7  ;;  %v1690_v5 = vld [vmem:[#allocation7 + $0x38] sm:$0xff]  ;;  %v1756_v7 = vld [vmem:[#allocation7 + $0xb0] sm:$0xff] }
 0x22d   : > { %v1355_v10 = vrot.slane %v1332_v6, 1  ;;  %v1413_v11 = vrot.slane %v1332_v6, 2  ;;  %v1449_v13 = vrot.slane %v1332_v6, 3  ;;  %v1485_v17 = vrot.slane %v1332_v6, 4  ;;  %v1722_v6 = vld [vmem:[#allocation7 + $0x68] sm:$0xff] }
 0x22f   : > { %v1356_v14 = vsel %vm567_vm1, %v1354_v8, %v1355_v10  ;;  %v1414_v15 = vsel %vm714_vm3, %v1412_v9, %v1413_v11  ;;  %v1450_v16 = vsel %vm801_vm4, %v1448_v12, %v1449_v13  ;;  %v1486_v19 = vsel %vm582_vm0, %v1484_v18, %v1485_v17  ;;  %v1689_v8 = vld [vmem:[#allocation7 + $0x30] sm:$0xff]  ;;  %v1755_v9 = vld [vmem:[#allocation7 + $0xa8] sm:$0xff]  ;;  %v1721_v10 = vld [vmem:[#allocation7 + $0x60] sm:$0xff] }
 0x230   : > { %2075 = vmatmul.msk.f32.vlgmr.msra.gmra.mxu2 %vm1357_vm7, %v1356_v14  ;;  %2086 = vmatmul.msk.f32.vlgmr.msra.gmra.mxu0 %vm1357_vm7, %v1414_v15  ;;  %v1790_v13 = vld [vmem:[#allocation7 + $0xf8] sm:$0xff]  ;;  %v1688_v14 = vld [vmem:[#allocation7 + $0x28] sm:$0xff]  ;;  %v1789_v15 = vld [vmem:[#allocation7 + $0xf0] sm:$0xff] }
 0x231   : > { %2096 = vmatmul.msk.f32.vlgmr.msra.gmra.mxu3 %vm1357_vm7, %v1450_v16  ;;  %1640 = vmatpush.msra.mxu2 %v2849_v21  ;;  %v1687_v16 = vld [vmem:[#allocation7 + $0x20] sm:$0xff]  ;;  %v1788_v17 = vld [vmem:[#allocation7 + $0xe8] sm:$0xff] }
 0x232   : > { %1736 = vmatpush.msra.mxu3 %v1724_v2  ;;  %v1754_v18 = vld [vmem:[#allocation7 + $0xa0] sm:$0xff]  ;;  %v1862_v2 = vld [vmem:[%s3151_s13 + $0x28] sm:$0xff] }
 0x233   : > { %1641 = vmatpush.msra.mxu2 %v2861_v23 }
 0x234   : > { %1737 = vmatpush.msra.mxu3 %v1723_v3  ;;  %v1861_v3 = vld [vmem:[%s3151_s13 + $0x20] sm:$0xff] }
 0x235   : > { %1642 = vmatpush.msra.mxu2 %v2871_v25 }
 0x236   : > { %1738 = vmatpush.msra.mxu3 %v1722_v6 }
 0x237   : > { %1643 = vmatpush.msra.mxu2 %v2883_v27 }
 0x238   : > { %2106 = vmatmul.msk.f32.vlgmr.msrb.gmra.mxu2 %vm1357_vm7, %v1486_v19  ;;  %1739 = vmatpush.msra.mxu3 %v1721_v10  ;;  %v1686_v19 = vld [vmem:[#allocation7 + $0x18] sm:$0xff] }
 0x239   : > { %1644 = vmatpush.msra.mxu2 %v2895_v29 }
 0x23b   : > { %1645 = vmatpush.msra.mxu2 %v2907_v31 }
 0x23d   : > { %1646 = vmatpush.msra.mxu2 %v2919_v33 }
 0x23f   : > { %1647 = vmatpush.msra.mxu2 %v2931_v35 }
 0x241   : > { %1648 = vmatpush.msra.mxu2 %v2943_v37 }
 0x243   : > { %1649 = vmatpush.msra.mxu2 %v1572_v41 }
 0x245   : > { %1650 = vmatpush.msra.mxu2 %v1571_v45 }
 0x247   : > { %1651 = vmatpush.msra.mxu2 %v1570_v48 }
 0x249   : > { %1652 = vmatpush.msra.mxu2 %v1569_v51 }
 0x24b   : > { %1653 = vmatpush.msra.mxu2 %v1568_v56 }
 0x24d   : > { %1654 = vmatpush.msra.mxu2 %v1567_v59 }
 0x24f   : > { %1655 = vmatpush.msra.mxu2 %v1566_v1 }
 0x251   : > { %1769 = vmatpush.msrb.mxu2 %v1757_v4  ;;  %v1860_v4 = vld [vmem:[%s3151_s13 + $0x18] sm:$0xff] }
 0x253   : > { %1770 = vmatpush.msrb.mxu2 %v1756_v7 }
 0x255   : > { %1771 = vmatpush.msrb.mxu2 %v1755_v9 }
 0x257   : > { %1772 = vmatpush.msrb.mxu2 %v1754_v18  ;;  %v1831_v18 = vld [vmem:[%s3150_s12] sm:$0x1] }
 0x2a2   : > { %v1399_v38 = vpop.f32.mrf.mxu1 }
 0x2ad   : > { %v1434_v43 = vpop.f32.mrf.mxu0 }
 0x2b3   : > { %v1377_v39 = vpop.f32.mrf.mxu2 }
 0x2b4   : > { %v1400_v42 = vadd.f32 %v1399_v38, %v1377_v39  ;;  %v1470_v49 = vpop.f32.mrf.mxu3  ;;  %v1828_v38 = vld [vmem:[%s3149_s11 + $0x60] sm:$0xff]  ;;  %v1827_v39 = vld [vmem:[%s3149_s11 + $0x58] sm:$0xff] }
 0x2b6   : > { %v1437_v46 = vadd.f32 %v1434_v43, %v1400_v42  ;;  %v1824_v42 = vld [vmem:[%s3149_s11 + $0x40] sm:$0xff]  ;;  %v1823_v43 = vld [vmem:[%s3149_s11 + $0x38] sm:$0xff] }
 0x2b8   : > { %v1473_v52 = vadd.f32 %v1470_v49, %v1437_v46 }
 0x2bb   : > { %v1506_v54 = vpop.f32.mrf.mxu2 }
 0x2bc   : > { %v1509_v57 = vadd.f32 %v1506_v54, %v1473_v52 }
 0x2be   : > { %v1514_v60 = vadd.f32 %v2214_v53, %v1509_v57  ;;  %v1819_v57 = vld [vmem:[%s3149_s11 + $0x18] sm:$0xff] }
 0x2c0   : > { %v1515_v61 = vmax.f32 %v1514_v60, 0.0  ;;  %v1816_v60 = vld [vmem:[%s3149_s11] sm:$0xff] }
 0x2c2   : > { %1536 = vmatpush.msra.mxu1 %v1515_v61  ;;  %1561 = vmatpush.msrb.mxu0 %v1515_v61  ;;  %v1867_v61 = vld [vmem:[%s3151_s13 + $0x50] sm:$0xf] }
 0x2c3   : > { %2107 = vmatmul.msk.f32.vlgmr.msra.gmra.mxu1 %vm1517_vm8, %v1516_v62  ;;  %2109 = vmatmul.msk.f32.vlgmr.msrb.gmra.mxu0 %vm1517_vm8, %v2108_v63  ;;  %v1866_v62 = vld [vmem:[%s3151_s13 + $0x48] sm:$0xff]  ;;  %v1865_v63 = vld [vmem:[%s3151_s13 + $0x40] sm:$0xff] }
 0x2c4   : > { %1582 = vmatpush.msrb.mxu1 %v2849_v21  ;;  %1660 = vmatpush.msra.mxu0 %v2844_v20  ;;  %v1787_v20 = vld [vmem:[#allocation7 + $0xe0] sm:$0xff]  ;;  %v1720_v21 = vld [vmem:[#allocation7 + $0x58] sm:$0xff] }
 0x2c5   : > { %1740 = vmatpush.msra.mxu3 %v1720_v21 }
 0x2c6   : > { %1583 = vmatpush.msrb.mxu1 %v2861_v23  ;;  %1661 = vmatpush.msra.mxu0 %v2856_v22  ;;  %v1753_v22 = vld [vmem:[#allocation7 + $0x98] sm:$0xff]  ;;  %v1685_v23 = vld [vmem:[#allocation7 + $0x10] sm:$0xff] }
 0x2c7   : > { %1773 = vmatpush.msrb.mxu2 %v1753_v22  ;;  %v1868_v22 = vld [vmem:[%s3179_s20] sm:$0x1] }
 0x2c8   : > { %1584 = vmatpush.msrb.mxu1 %v2871_v25  ;;  %1662 = vmatpush.msra.mxu0 %v2866_v24  ;;  %v1786_v24 = vld [vmem:[#allocation7 + $0xd8] sm:$0xff]  ;;  %v1719_v25 = vld [vmem:[#allocation7 + $0x50] sm:$0xff] }
 0x2c9   : > { %1741 = vmatpush.msra.mxu3 %v1719_v25 }
 0x2ca   : > { %1585 = vmatpush.msrb.mxu1 %v2883_v27  ;;  %1663 = vmatpush.msra.mxu0 %v2878_v26  ;;  %v1752_v26 = vld [vmem:[#allocation7 + $0x90] sm:$0xff]  ;;  %v1684_v27 = vld [vmem:[#allocation7 + $0x8] sm:$0xff] }
 0x2cb   : > { %1774 = vmatpush.msrb.mxu2 %v1752_v26 }
 0x2cc   : > { %1586 = vmatpush.msrb.mxu1 %v2895_v29  ;;  %1664 = vmatpush.msra.mxu0 %v2890_v28  ;;  %v1785_v28 = vld [vmem:[#allocation7 + $0xd0] sm:$0xff]  ;;  %v1718_v29 = vld [vmem:[#allocation7 + $0x48] sm:$0xff] }
 0x2cd   : > { %1742 = vmatpush.msra.mxu3 %v1718_v29 }
 0x2ce   : > { %1587 = vmatpush.msrb.mxu1 %v2907_v31  ;;  %1665 = vmatpush.msra.mxu0 %v2902_v30  ;;  %v1751_v30 = vld [vmem:[#allocation7 + $0x88] sm:$0xff]  ;;  %v1683_v31 = vld [vmem:[#allocation7] sm:$0xff] }
 0x2cf   : > { %1775 = vmatpush.msrb.mxu2 %v1751_v30 }
 0x2d0   : > { %1588 = vmatpush.msrb.mxu1 %v2919_v33  ;;  %1666 = vmatpush.msra.mxu0 %v2914_v32  ;;  %v1717_v32 = vld [vmem:[#allocation7 + $0x40] sm:$0xff]  ;;  %v1784_v33 = vld [vmem:[#allocation7 + $0xc8] sm:$0xff] }
 0x2d1   : > { %1743 = vmatpush.msra.mxu3 %v1717_v32 }
 0x2d2   : > { %1589 = vmatpush.msrb.mxu1 %v2931_v35  ;;  %1667 = vmatpush.msra.mxu0 %v2926_v34  ;;  %v1750_v34 = vld [vmem:[#allocation7 + $0x80] sm:$0xff] }
 0x2d3   : > { %v1783_v35 = vld [vmem:[#allocation7 + $0xc0] sm:$0xff]  ;;  %1776 = vmatpush.msrb.mxu2 %v1750_v34 }
 0x2d4   : > { %1590 = vmatpush.msrb.mxu1 %v2943_v37  ;;  %1668 = vmatpush.msra.mxu0 %v2938_v36  ;;  %v1830_v36 = vld [vmem:[%s3149_s11 + $0x70] sm:$0xff]  ;;  %v1829_v37 = vld [vmem:[%s3149_s11 + $0x68] sm:$0xff] }
 0x2d6   : > { %1591 = vmatpush.msrb.mxu1 %v1572_v41  ;;  %1669 = vmatpush.msra.mxu0 %v2116_v40  ;;  %v1826_v40 = vld [vmem:[%s3149_s11 + $0x50] sm:$0xff]  ;;  %v1825_v41 = vld [vmem:[%s3149_s11 + $0x48] sm:$0xff] }
 0x2d8   : > { %1592 = vmatpush.msrb.mxu1 %v1571_v45  ;;  %1670 = vmatpush.msra.mxu0 %v2115_v44  ;;  %v1822_v44 = vld [vmem:[%s3149_s11 + $0x30] sm:$0xff] }
 0x2da   : > { %1593 = vmatpush.msrb.mxu1 %v1570_v48  ;;  %1671 = vmatpush.msra.mxu0 %v2114_v47 }
 0x2dc   : > { %1594 = vmatpush.msrb.mxu1 %v1569_v51  ;;  %1672 = vmatpush.msra.mxu0 %v2113_v50 }
 0x2de   : > { %1595 = vmatpush.msrb.mxu1 %v1568_v56  ;;  %1673 = vmatpush.msra.mxu0 %v2112_v55  ;;  %v1821_v55 = vld [vmem:[%s3149_s11 + $0x28] sm:$0xff]  ;;  %v1820_v56 = vld [vmem:[%s3149_s11 + $0x20] sm:$0xff] }
 0x2e0   : > { %1596 = vmatpush.msrb.mxu1 %v1567_v59  ;;  %1674 = vmatpush.msra.mxu0 %v2111_v58  ;;  %v1818_v58 = vld [vmem:[%s3149_s11 + $0x10] sm:$0xff]  ;;  %v1817_v59 = vld [vmem:[%s3149_s11 + $0x8] sm:$0xff] }
 0x2e2   : > { %1597 = vmatpush.msrb.mxu1 %v1566_v1  ;;  %1675 = vmatpush.msra.mxu0 %v2110_v0  ;;  %v1864_v0 = vld [vmem:[%s3151_s13 + $0x38] sm:$0xff]  ;;  %v1863_v1 = vld [vmem:[%s3151_s13 + $0x30] sm:$0xff] }
 0x2e4   : > { %1703 = vmatpush.msra.mxu1 %v1690_v5  ;;  %1802 = vmatpush.msrb.mxu0 %v1790_v13  ;;  %v1682_v5 = vld [vmem:[%s3148_s10] sm:$0x1] }
 0x2e6   : > { %1704 = vmatpush.msra.mxu1 %v1689_v8  ;;  %1803 = vmatpush.msrb.mxu0 %v1789_v15  ;;  %v1859_v15 = vld [vmem:[%s3151_s13 + $0x10] sm:$0xff] }
 0x2e8   : > { %1705 = vmatpush.msra.mxu1 %v1688_v14  ;;  %1804 = vmatpush.msrb.mxu0 %v1788_v17  ;;  %v1857_v17 = vld [vmem:[%s3151_s13] sm:$0xff] }
 0x2ea   : > { %1706 = vmatpush.msra.mxu1 %v1687_v16  ;;  %1805 = vmatpush.msrb.mxu0 %v1787_v20  ;;  %v1858_v16 = vld [vmem:[%s3151_s13 + $0x8] sm:$0xff] }
 0x2ec   : > { %1707 = vmatpush.msra.mxu1 %v1686_v19  ;;  %1806 = vmatpush.msrb.mxu0 %v1786_v24 }
 0x2ee   : > { %1708 = vmatpush.msra.mxu1 %v1685_v23  ;;  %1807 = vmatpush.msrb.mxu0 %v1785_v28 }
 0x2f0   : > { %1709 = vmatpush.msra.mxu1 %v1684_v27  ;;  %1808 = vmatpush.msrb.mxu0 %v1784_v33 }
 0x2f2   : > { %1710 = vmatpush.msra.mxu1 %v1683_v31  ;;  %1809 = vmatpush.msrb.mxu0 %v1783_v35 }
 0x340   : > { %v1538_v11 = vpop.f32.mrf.mxu1  ;;  %v1563_v12 = vpop.f32.mrf.mxu0 }
 0x341   : > { %1635 = vmatmul.f32.vlgmr.msrb.gmra.mxu3 %v1538_v11  ;;  %1656 = vmatmul.f32.vlgmr.msra.gmra.mxu2 %v1563_v12 }
 0x342   : > { %1598 = vmatmul.f32.vlgmr.msrb.gmra.mxu1 %v1538_v11  ;;  %1676 = vmatmul.f32.vlgmr.msra.gmra.mxu0 %v1563_v12 }
 0x343   : > { %1837 = vmatpush.msrb.mxu1 %v1830_v36  ;;  %2131 = vmatpush.msk.msrb.mxu3 %vm582_vm0, %v1867_v61 }
 0x345   : > { %1838 = vmatpush.msrb.mxu1 %v1829_v37  ;;  %1882 = vmatpush.msrb.mxu3 %v1866_v62 }
 0x347   : > { %1839 = vmatpush.msrb.mxu1 %v1828_v38  ;;  %1883 = vmatpush.msrb.mxu3 %v1865_v63 }
 0x349   : > { %1840 = vmatpush.msrb.mxu1 %v1827_v39  ;;  %1884 = vmatpush.msrb.mxu3 %v1864_v0 }
 0x34b   : > { %1841 = vmatpush.msrb.mxu1 %v1826_v40  ;;  %1885 = vmatpush.msrb.mxu3 %v1863_v1 }
 0x34d   : > { %1842 = vmatpush.msrb.mxu1 %v1825_v41  ;;  %1886 = vmatpush.msrb.mxu3 %v1862_v2 }
 0x34f   : > { %1843 = vmatpush.msrb.mxu1 %v1824_v42  ;;  %1887 = vmatpush.msrb.mxu3 %v1861_v3 }
 0x351   : > { %1844 = vmatpush.msrb.mxu1 %v1823_v43  ;;  %1888 = vmatpush.msrb.mxu3 %v1860_v4 }
 0x353   : > { %1845 = vmatpush.msrb.mxu1 %v1822_v44  ;;  %1889 = vmatpush.msrb.mxu3 %v1859_v15 }
 0x355   : > { %1846 = vmatpush.msrb.mxu1 %v1821_v55  ;;  %1890 = vmatpush.msrb.mxu3 %v1858_v16 }
 0x357   : > { %1847 = vmatpush.msrb.mxu1 %v1820_v56  ;;  %1891 = vmatpush.msrb.mxu3 %v1857_v17 }
 0x359   : > { %1848 = vmatpush.msrb.mxu1 %v1819_v57 }
 0x35b   : > { %1849 = vmatpush.msrb.mxu1 %v1818_v58 }
 0x35d   : > { %1850 = vmatpush.msrb.mxu1 %v1817_v59 }
 0x35f   : > { %1851 = vmatpush.msrb.mxu1 %v1816_v60 }
 0x3bf   : > { %v1599_v45 = vpop.f32.mrf.mxu1  ;;  %v1677_v46 = vpop.f32.mrf.mxu0 }
 0x3c4   : > { %v1636_v47 = vpop.f32.mrf.mxu3  ;;  %v1657_v48 = vpop.f32.mrf.mxu2 }
 0x3c5   : > { %v1639_v49 = vmax.f32 %v1599_v45, %v1636_v47  ;;  %v1680_v50 = vmax.f32 %v1657_v48, %v1677_v46 }
 0x3c7   : > { %v1681_v51 = vmax.f32 %v1639_v49, %v1680_v50 }
 0x3c9   : > { %v1725_v52 = vrot.slane %v1681_v51, 1  ;;  %v1758_v53 = vrot.slane %v1681_v51, 2  ;;  %v1791_v54 = vrot.slane %v1681_v51, 3  ;;  %2126 = vmatmul.msk.f32.vlgmr.msra.gmra.mxu1 %vm1691_vm9, %v1681_v51 }
 0x3cb   : > { %2127 = vmatmul.msk.f32.vlgmr.msra.gmra.mxu3 %vm1691_vm9, %v1725_v52  ;;  %2128 = vmatmul.msk.f32.vlgmr.msrb.gmra.mxu2 %vm1691_vm9, %v1758_v53 }
 0x3cc   : > { %2129 = vmatmul.msk.f32.vlgmr.msrb.gmra.mxu0 %vm1691_vm9, %v1791_v54 }
 0x446   : > { %v1712_v7 = vpop.f32.mrf.mxu1 }
 0x447   : > { %v1715_v6 = vadd.f32 %v1712_v7, %v1682_v5 }
 0x449   : > { %v1811_v12 = vpop.f32.mrf.mxu0 }
 0x44e   : > { %v1745_v8 = vpop.f32.mrf.mxu3  ;;  %v1778_v10 = vpop.f32.mrf.mxu2 }
 0x44f   : > { %v1748_v9 = vadd.f32 %v1745_v8, %v1715_v6 }
 0x451   : > { %v1781_v11 = vadd.f32 %v1778_v10, %v1748_v9 }
 0x453   : > { %v1814_v13 = vadd.f32 %v1811_v12, %v1781_v11 }
 0x455   : > { %v1815_v14 = vmax.f32 %v1814_v13, 0.0 }
 0x457   : > { %2130 = vmatmul.msk.f32.vlgmr.msrb.gmra.mxu1 %vm1832_vm10, %v1815_v14 }
 0x4d4   : > { %v1853_v19 = vpop.f32.mrf.mxu1 }
 0x4d5   : > { %v1854_v20 = vadd.f32 %v1853_v19, %v1831_v18 }
 0x4d7   : > { %v1856_v21 = vmax.f32 %v1854_v20, 0.0 }
 0x4d9   : > { %2132 = vmatmul.msk.f32.vlgmr.msrb.gmra.mxu3 %vm1869_vm11, %v1856_v21 }
 0x55c   : > { %v1893_v23 = vpop.f32.mrf.mxu3 }
 0x55d   : > { %v1894_v24 = vadd.f32 %v1893_v23, %v1868_v22 }
 0x55f   : > { %1896 = vst [vmem:[%s536_s24] sm:$0x1] %v1894_v24 }
 0x560   : > { %2332 = shalt.err (!%p2329_p8)
}
 0x561   : > { %2152 = dma.vmem_to_hbm [thread:$0]  (%p2502_p5), %s1909_s4, 16, %s1911_s1, %s1898_s14  }
 0x562 PF: > { %s3180_s29 = sld [smem:[#allocation14_spill]] }
 0x563   : > { %s3181_s16 = sld [smem:[#allocation12_spill]] }
 0x568   : > { %p2174_p9 = scmp.ge.s32.totalorder %s3180_s29, 2 }
 0x569   : > { %s1922_s25 = sand.u32 1, %s3181_s16  }
 0x56a   : > { %p2165_p10 = pnand %p2174_p9, %p2506_p6  ;;  %s1923_s20 = scalar_lea.sflag [#allocation4], %s1922_s25 }
 0x56c   : > { %p2166_p11 = pneg %p2165_p10 }
 0x56e   : > { %2358 = dma.done.wait (%p2166_p11), %s1923_s20, 16  }
 0x56f   : > { %2360 = vsyncadd (%p2166_p11), %s1923_s20, 4294967280  ;;  %s3183_s21 = sld [smem:[#allocation15_spill]]  ;;  %s3186_s18 = smov %s2367_s19 }
 0x570   : > { %s3184_s24 = sld [smem:[#allocation13_spill]] }
 0x571   : > { %s3185_s20 = sld [smem:[#allocation16_spill]] }
 0x575   : > { %p27_p12 = scmp.ge.s32.totalorder %s3183_s21, 4  }
 0x576   : > { %s3187_s19 = smov %s3184_s24 }
 0x577   :  { %29 = sbr.rel (!%p27_p12) target bundleno = 9 (0x9), region = 143 }
 0x57c   :  { %1928 = vsyncpa [#allocation3], 1 }
 0x57d   :  { %1930 = vsyncpa [#allocation3 + $0x1], 1 }
 0x57e   :  { %1931 = vsyncpa [#allocation6], 1 }
 0x57f   :  { %1932 = vsyncpa [#allocation4], 1 }
 0x580   :  { %1934 = vsyncpa [#allocation4 + $0x1], 1 }

</bundles_post_ra>
